<compile_context>
chip_gen: v5e
topology: v5e:2x2
jax: 0.10.0
libtpu: 0.0.40
codegen_flags: <defaults>
</compile_context>

<pallas_src>
import functools

import jax
import jax.numpy as jnp
import numpy as np
from jax.experimental import pallas as pl
from jax.experimental.pallas import tpu as pltpu

_HALO = 8          # >= pad=(K-1)//2=7, rounded up to a full sublane group
_EPS = 1e-5        # nn.BatchNorm1d default


def _round_up(n, m):
    return ((n + m - 1) // m) * m


# --------------------------------------------------------------------------------------
# Kernel
# --------------------------------------------------------------------------------------
def conv_module_kernel(x_ref, hp_ref, hn_ref,
                       w1_ref, b1_ref, wdf_ref, bdf_ref, w2_ref, b2_ref,
                       o_ref, glu_ref,
                       *, true_t, t_tile, k_size, compute_dtype):
    """One (batch, time-tile) block per grid step."""
    t = pl.program_id(1)
    C = x_ref.shape[2]
    H = _HALO
    pad = (k_size - 1) // 2
    base = H - pad                       # local row offset of the first tap
    rows = t_tile + 2 * H
    glu_dtype = glu_ref.dtype

    w1 = w1_ref[...]                     # (C, 2C) compute dtype (fused GLU halves)
    b1 = b1_ref[...]                     # (1, 2C) f32

    def glu_of(xin):                     # (n, C) -> GLU(pointwise_conv1(x)), (n, C)
        y = jnp.dot(xin.astype(compute_dtype), w1,
                    preferred_element_type=jnp.float32) + b1
        return (y[:, :C] * jax.nn.sigmoid(y[:, C:])).astype(glu_dtype)

    # Each section lands at a sublane-aligned offset of the VMEM scratch; no concat.
    glu_ref[0:H, :] = glu_of(hp_ref[0])                     # prev halo
    glu_ref[H:H + t_tile, :] = glu_of(x_ref[0])             # current tile
    glu_ref[H + t_tile:rows, :] = glu_of(hn_ref[0])         # next halo

    # Zero rows whose global time index lies outside [0, true_t): reproduces the
    # depthwise conv's 'same' zero padding and kills the GLU-bias leak from padded /
    # clamped-halo rows.  Only boundary tiles need it.
    @pl.when((t == 0) | ((t + 1) * t_tile + H > true_t))
    def _():
        row = jax.lax.broadcasted_iota(jnp.int32, (rows, 1), 0) + (t * t_tile - H)
        keep = (row >= 0) & (row < true_t)
        glu_ref[...] = jnp.where(keep, glu_ref[...],
                                 jnp.zeros((), glu_dtype)).astype(glu_dtype)

    # ---- depthwise conv (K taps); eval-BatchNorm + depthwise bias pre-folded ----
    wdf = wdf_ref[...]                                      # (K, C) f32
    acc = jnp.zeros((t_tile, C), jnp.float32)
    for kk in range(k_size):                                # static unroll
        tap = glu_ref[base + kk:base + kk + t_tile, :].astype(jnp.float32)
        acc = acc + tap * wdf[kk:kk + 1, :]
    xr = jnp.maximum(acc + bdf_ref[...], 0.0)               # BN folded; ReLU

    # ---- pointwise_conv2 ----
    out = jnp.dot(xr.astype(compute_dtype), w2_ref[...],
                  preferred_element_type=jnp.float32) + b2_ref[...]
    o_ref[0] = out.astype(o_ref.dtype)


# --------------------------------------------------------------------------------------
# Host-side parameter preparation (layout transpose + eval-BN folding)
# --------------------------------------------------------------------------------------
def prepare_params(torch_params, *, compute_dtype=jnp.bfloat16, eps=_EPS):
    (w1, b1, wd, bd, gamma, beta, mean, var, w2, b2) = torch_params
    # pointwise_conv1: (2C, C, 1) -> fused (C, 2C) for x @ W; cols [:C]=a, [C:]=gate.
    w1f = jnp.transpose(w1[:, :, 0]).astype(compute_dtype)
    b1f = b1[None, :].astype(jnp.float32)
    # depthwise: (C, 1, K) -> (K, C); fold eval-mode BatchNorm (and depthwise bias) in.
    s = gamma * jax.lax.rsqrt(var + eps)                    # (C,)
    wdf = (jnp.transpose(wd[:, 0, :]) * s[None, :]).astype(jnp.float32)   # (K, C)
    bdf = ((bd - mean) * s + beta)[None, :].astype(jnp.float32)           # (1, C)
    # pointwise_conv2: (C, C, 1) -> (C, C)
    w2k = jnp.transpose(w2[:, :, 0]).astype(compute_dtype)
    b2k = b2[None, :].astype(jnp.float32)
    return (w1f, b1f, wdf, bdf, w2k, b2k)


# --------------------------------------------------------------------------------------
# Wrapper
# --------------------------------------------------------------------------------------
def convolution_module_forward(x, torch_params, *, t_tile=1024,
                               compute_dtype=jnp.bfloat16,
                               glu_scratch_dtype=None, eps=_EPS):
    """x: (B, T, C) float32. Returns (out (B, T, C), new_cache (0,0,0))."""
    B, T, C = x.shape
    K = torch_params[2].shape[-1]
    pad = (K - 1) // 2
    assert (K - 1) % 2 == 0, "non-causal ConvolutionModule requires odd kernel_size"
    assert pad <= _HALO, f"kernel_size={K} needs halo {pad} > supported {_HALO}"
    H = _HALO

    if glu_scratch_dtype is None:
        # bf16 scratch halves depthwise tap-load traffic on v6e/v7x; on v5e (no bf16
        # VALU) pass glu_scratch_dtype=jnp.float32 explicitly.
        glu_scratch_dtype = (jnp.bfloat16
                             if jnp.dtype(compute_dtype) == jnp.dtype(jnp.bfloat16)
                             else jnp.float32)

    (w1f, b1f, wdf, bdf, w2k, b2k) = prepare_params(
        torch_params, compute_dtype=compute_dtype, eps=eps)

    # Time tiling: T_TILE multiple of 8; T padded (tail only) to a whole number of tiles.
    T_TILE = _round_up(min(int(t_tile), max(T, 8)), 8)
    if B == 1 and T > 8:                     # keep >= 2 grid steps for 2-TC chips (v7x)
        T_TILE = min(T_TILE, _round_up(-(-T // 2), 8))
    NT = -(-T // T_TILE)
    T_pad = NT * T_TILE

    x_p = jnp.pad(x, ((0, 0), (0, T_pad - T), (0, 0)))      # single tail pad only

    hpb = T_TILE // H                        # halo blocks per time tile
    n_hblocks = T_pad // H

    kernel = functools.partial(conv_module_kernel, true_t=T, t_tile=T_TILE,
                               k_size=K, compute_dtype=compute_dtype)

    def const_spec(shape):
        return pl.BlockSpec(shape, lambda b, t: (0,) * len(shape))

    grid_spec = pltpu.PrefetchScalarGridSpec(
        num_scalar_prefetch=0,
        grid=(B, NT),
        in_specs=[
            # main tile
            pl.BlockSpec((1, T_TILE, C), lambda b, t: (b, t, 0)),
            # prev halo: 8 rows before the tile (clamped at t=0; content masked in-kernel)
            pl.BlockSpec((1, H, C),
                         lambda b, t: (b, jnp.maximum(t * hpb - 1, 0), 0)),
            # next halo: 8 rows after the tile (clamped at last tile; masked in-kernel)
            pl.BlockSpec((1, H, C),
                         lambda b, t: (b, jnp.minimum((t + 1) * hpb, n_hblocks - 1), 0)),
            const_spec((C, 2 * C)), const_spec((1, 2 * C)),   # w1f, b1f
            const_spec((K, C)), const_spec((1, C)),           # wdf, bdf
            const_spec((C, C)), const_spec((1, C)),           # w2, b2
        ],
        out_specs=pl.BlockSpec((1, T_TILE, C), lambda b, t: (b, t, 0)),
        scratch_shapes=[pltpu.VMEM((T_TILE + 2 * H, C), glu_scratch_dtype)],
    )

    # VMEM budget derived from actual tile sizes (double-buffered operands + scratch +
    # in-kernel f32 temporaries), floor 16 MiB, cap 64 MiB (v7x physical).
    db = 2
    csz = jnp.dtype(compute_dtype).itemsize
    gsz = jnp.dtype(glu_scratch_dtype).itemsize
    est = db * (2 * T_TILE * C * 4            # x tile in + out tile
                + 2 * H * C * 4               # halo tiles
                + 3 * C * C * csz             # w1f (C,2C) + w2 (C,C)
                + (K + 4) * C * 4)            # wdf + biases
    est += (T_TILE + 2 * H) * C * gsz         # glu scratch
    est += 4 * T_TILE * C * 4                 # y / acc / xr temporaries
    vmem_limit = int(min(max(2 * est, 16 * 1024 * 1024), 64 * 1024 * 1024))

    out_p = pl.pallas_call(
        kernel,
        out_shape=jax.ShapeDtypeStruct((B, T_pad, C), x.dtype),
        grid_spec=grid_spec,
        compiler_params=pltpu.CompilerParams(
            dimension_semantics=("parallel", "parallel"),
            vmem_limit_bytes=vmem_limit,
        ),
    )(x_p, x_p, x_p, w1f, b1f, wdf, bdf, w2k, b2k)

    out = out_p[:, :T, :]                     # rows [T, T_pad) are garbage; slice here
    new_cache = jnp.zeros((0, 0, 0), dtype=x.dtype)   # non-causal: lorder == 0
    return out, new_cache


# --------------------------------------------------------------------------------------
# Pure-JAX reference (mirrors the PyTorch forward: default args, eval-mode BatchNorm)
# --------------------------------------------------------------------------------------
def reference_forward(x, torch_params, eps=_EPS):
    (w1, b1, wd, bd, gamma, beta, mean, var, w2, b2) = torch_params
    B, T, C = x.shape
    K = wd.shape[-1]
    pad = (K - 1) // 2

    y = jnp.einsum('btc,oc->bto', x, w1[:, :, 0], precision='highest') + b1
    a, g = y[..., :C], y[..., C:]
    xg = a * jax.nn.sigmoid(g)

    xp = jnp.pad(xg, ((0, 0), (pad, pad), (0, 0)))
    wd_kc = jnp.transpose(wd[:, 0, :])                       # (K, C)
    acc = jnp.zeros_like(xg)
    for k in range(K):
        acc = acc + xp[:, k:k + T, :] * wd_kc[k][None, None, :]
    acc = acc + bd

    xn = (acc - mean) * jax.lax.rsqrt(var + eps) * gamma + beta
    xr = jnp.maximum(xn, 0.0)
    out = jnp.einsum('btc,oc->bto', xr, w2[:, :, 0], precision='highest') + b2
    return out


def make_params(key, C, K):
    """Parameters in PyTorch layout: Conv1d weights (out, in, k), BatchNorm1d vectors (C,)."""
    ks = jax.random.split(key, 10)
    w1 = 0.1 * jax.random.normal(ks[0], (2 * C, C, 1), jnp.float32)
    b1 = 0.1 * jax.random.normal(ks[1], (2 * C,), jnp.float32)
    wd = 0.1 * jax.random.normal(ks[2], (C, 1, K), jnp.float32)
    bd = 0.1 * jax.random.normal(ks[3], (C,), jnp.float32)
    gamma = 1.0 + 0.05 * jax.random.normal(ks[4], (C,), jnp.float32)
    beta = 0.05 * jax.random.normal(ks[5], (C,), jnp.float32)
    mean = 0.1 * jax.random.normal(ks[6], (C,), jnp.float32)
    var = 1.0 + 0.1 * jnp.abs(jax.random.normal(ks[7], (C,), jnp.float32))
    w2 = 0.1 * jax.random.normal(ks[8], (C, C, 1), jnp.float32)
    b2 = 0.1 * jax.random.normal(ks[9], (C,), jnp.float32)
    return (w1, b1, wd, bd, gamma, beta, mean, var, w2, b2)


if __name__ == "__main__":
    # C=128 keeps lanes dense; T=40 with t_tile=32 exercises multi-tile halos, the
    # partial last tile and the boundary masks.
    B, T, C, K = 2, 40, 128, 15
    key = jax.random.PRNGKey(0)
    kx, kp = jax.random.split(key)
    x = jax.random.normal(kx, (B, T, C), jnp.float32)
    tp = make_params(kp, C, K)

    ref = reference_forward(x, tp)

    # f32 MXU path with a small time tile: tight tolerance, exercises tiling/halos/masks.
    out32, cache = convolution_module_forward(x, tp, t_tile=32,
                                              compute_dtype=jnp.float32)
    out32 = jax.block_until_ready(out32)
    np.testing.assert_allclose(np.asarray(out32), np.asarray(ref), rtol=1e-2, atol=1e-2)
    assert cache.shape == (0, 0, 0)

    # Default path: bf16 MXU inputs, f32 accumulation, bf16 GLU scratch, default tile.
    out_bf, _ = convolution_module_forward(x, tp)
    out_bf = jax.block_until_ready(out_bf)
    np.testing.assert_allclose(np.asarray(out_bf), np.asarray(ref), rtol=1e-1, atol=1e-1)

    print("KERNEL_OK")
</pallas_src>

<mosaic_0001>
module attributes {stable_mosaic.version = 11 : i64} {
  func.func @conv_module_kernel(%arg0: i32, %arg1: i32, %arg2: memref<1x32x128xf32, #tpu.memory_space<vmem>>, %arg3: memref<1x8x128xf32, #tpu.memory_space<vmem>>, %arg4: memref<1x8x128xf32, #tpu.memory_space<vmem>>, %arg5: memref<128x256xf32, #tpu.memory_space<vmem>>, %arg6: memref<1x256xf32, #tpu.memory_space<vmem>>, %arg7: memref<15x128xf32, #tpu.memory_space<vmem>>, %arg8: memref<1x128xf32, #tpu.memory_space<vmem>>, %arg9: memref<128x128xf32, #tpu.memory_space<vmem>>, %arg10: memref<1x128xf32, #tpu.memory_space<vmem>>, %arg11: memref<1x32x128xf32, #tpu.memory_space<vmem>>, %arg12: memref<48x128xf32, #tpu.memory_space<vmem>>) attributes {dimension_semantics = [#tpu.dimension_semantics<parallel>, #tpu.dimension_semantics<parallel>], iteration_bounds = array<i64: 2, 2>, scalar_prefetch = 0 : i64, scratch_operands = 1 : i64, tpu.core_type = #tpu.core_type<tc>, window_params = [{transform_indices = @transform_0, window_bounds = array<i64: 1, 32, 128>}, {transform_indices = @transform_1, window_bounds = array<i64: 1, 8, 128>}, {transform_indices = @transform_2, window_bounds = array<i64: 1, 8, 128>}, {pipeline_mode = #tpu.pipeline_mode<synchronous>, transform_indices = @transform_3, window_bounds = array<i64: 128, 256>}, {pipeline_mode = #tpu.pipeline_mode<synchronous>, transform_indices = @transform_4, window_bounds = array<i64: 1, 256>}, {pipeline_mode = #tpu.pipeline_mode<synchronous>, transform_indices = @transform_5, window_bounds = array<i64: 15, 128>}, {pipeline_mode = #tpu.pipeline_mode<synchronous>, transform_indices = @transform_6, window_bounds = array<i64: 1, 128>}, {pipeline_mode = #tpu.pipeline_mode<synchronous>, transform_indices = @transform_7, window_bounds = array<i64: 128, 128>}, {pipeline_mode = #tpu.pipeline_mode<synchronous>, transform_indices = @transform_8, window_bounds = array<i64: 1, 128>}, {transform_indices = @transform_9, window_bounds = array<i64: 1, 32, 128>}]} {
    %c0 = arith.constant 0 : index
    %c0_0 = arith.constant 0 : index
    %0 = vector.load %arg5[%c0, %c0_0] : memref<128x256xf32, #tpu.memory_space<vmem>>, vector<128x256xf32>
    %c0_1 = arith.constant 0 : index
    %c0_2 = arith.constant 0 : index
    %1 = vector.load %arg6[%c0_1, %c0_2] : memref<1x256xf32, #tpu.memory_space<vmem>>, vector<1x256xf32>
    %c0_3 = arith.constant 0 : index
    %c0_4 = arith.constant 0 : index
    %c0_5 = arith.constant 0 : index
    %2 = vector.load %arg3[%c0_3, %c0_4, %c0_5] : memref<1x8x128xf32, #tpu.memory_space<vmem>>, vector<1x8x128xf32>
    %3 = vector.shape_cast %2 : vector<1x8x128xf32> to vector<8x128xf32>
    %cst = arith.constant dense<0.000000e+00> : vector<8x256xf32>
    %4 = tpu.matmul %3, %0, %cst {dimension_numbers = #tpu.dot_dimension_numbers<[1], [0], [0], [1], [0, 0, 1, 1], [], []>} : vector<8x128xf32>, vector<128x256xf32>, vector<8x256xf32> -> vector<8x256xf32>
    %5 = vector.broadcast %1 : vector<1x256xf32> to vector<8x256xf32>
    %6 = arith.addf %4, %5 : vector<8x256xf32>
    %7 = vector.extract_strided_slice %6 {offsets = [0, 0], sizes = [8, 128], strides = [1, 1]} : vector<8x256xf32> to vector<8x128xf32>
    %8 = vector.extract_strided_slice %6 {offsets = [0, 128], sizes = [8, 128], strides = [1, 1]} : vector<8x256xf32> to vector<8x128xf32>
    %9 = arith.negf %8 : vector<8x128xf32>
    %10 = math.exp %9 : vector<8x128xf32>
    %cst_6 = arith.constant 1.000000e+00 : f32
    %11 = vector.broadcast %cst_6 : f32 to vector<8x128xf32>
    %12 = arith.addf %11, %10 : vector<8x128xf32>
    %13 = arith.divf %11, %12 : vector<8x128xf32>
    %14 = arith.mulf %7, %13 : vector<8x128xf32>
    %c0_7 = arith.constant 0 : index
    %c0_8 = arith.constant 0 : index
    %15 = vector.load %arg12[%c0_7, %c0_8] : memref<48x128xf32, #tpu.memory_space<vmem>>, vector<8x128xf32>
    tpu.vector_store %arg12[%c0_7, %c0_8], %14 {strides = array<i32>} : memref<48x128xf32, #tpu.memory_space<vmem>>, vector<8x128xf32>,
    %c0_9 = arith.constant 0 : index
    %c0_10 = arith.constant 0 : index
    %c0_11 = arith.constant 0 : index
    %16 = vector.load %arg2[%c0_9, %c0_10, %c0_11] : memref<1x32x128xf32, #tpu.memory_space<vmem>>, vector<1x32x128xf32>
    %17 = vector.shape_cast %16 : vector<1x32x128xf32> to vector<32x128xf32>
    %cst_12 = arith.constant dense<0.000000e+00> : vector<32x256xf32>
    %18 = tpu.matmul %17, %0, %cst_12 {dimension_numbers = #tpu.dot_dimension_numbers<[1], [0], [0], [1], [0, 0, 1, 1], [], []>} : vector<32x128xf32>, vector<128x256xf32>, vector<32x256xf32> -> vector<32x256xf32>
    %19 = vector.broadcast %1 : vector<1x256xf32> to vector<32x256xf32>
    %20 = arith.addf %18, %19 : vector<32x256xf32>
    %21 = vector.extract_strided_slice %20 {offsets = [0, 0], sizes = [32, 128], strides = [1, 1]} : vector<32x256xf32> to vector<32x128xf32>
    %22 = vector.extract_strided_slice %20 {offsets = [0, 128], sizes = [32, 128], strides = [1, 1]} : vector<32x256xf32> to vector<32x128xf32>
    %23 = arith.negf %22 : vector<32x128xf32>
    %24 = math.exp %23 : vector<32x128xf32>
    %cst_13 = arith.constant 1.000000e+00 : f32
    %25 = vector.broadcast %cst_13 : f32 to vector<32x128xf32>
    %26 = arith.addf %25, %24 : vector<32x128xf32>
    %27 = arith.divf %25, %26 : vector<32x128xf32>
    %28 = arith.mulf %21, %27 : vector<32x128xf32>
    %c8 = arith.constant 8 : index
    %c0_14 = arith.constant 0 : index
    %29 = vector.load %arg12[%c8, %c0_14] : memref<48x128xf32, #tpu.memory_space<vmem>>, vector<32x128xf32>
    tpu.vector_store %arg12[%c8, %c0_14], %28 {strides = array<i32>} : memref<48x128xf32, #tpu.memory_space<vmem>>, vector<32x128xf32>,
    %c0_15 = arith.constant 0 : index
    %c0_16 = arith.constant 0 : index
    %c0_17 = arith.constant 0 : index
    %30 = vector.load %arg4[%c0_15, %c0_16, %c0_17] : memref<1x8x128xf32, #tpu.memory_space<vmem>>, vector<1x8x128xf32>
    %31 = vector.shape_cast %30 : vector<1x8x128xf32> to vector<8x128xf32>
    %cst_18 = arith.constant dense<0.000000e+00> : vector<8x256xf32>
    %32 = tpu.matmul %31, %0, %cst_18 {dimension_numbers = #tpu.dot_dimension_numbers<[1], [0], [0], [1], [0, 0, 1, 1], [], []>} : vector<8x128xf32>, vector<128x256xf32>, vector<8x256xf32> -> vector<8x256xf32>
    %33 = vector.broadcast %1 : vector<1x256xf32> to vector<8x256xf32>
    %34 = arith.addf %32, %33 : vector<8x256xf32>
    %35 = vector.extract_strided_slice %34 {offsets = [0, 0], sizes = [8, 128], strides = [1, 1]} : vector<8x256xf32> to vector<8x128xf32>
    %36 = vector.extract_strided_slice %34 {offsets = [0, 128], sizes = [8, 128], strides = [1, 1]} : vector<8x256xf32> to vector<8x128xf32>
    %37 = arith.negf %36 : vector<8x128xf32>
    %38 = math.exp %37 : vector<8x128xf32>
    %cst_19 = arith.constant 1.000000e+00 : f32
    %39 = vector.broadcast %cst_19 : f32 to vector<8x128xf32>
    %40 = arith.addf %39, %38 : vector<8x128xf32>
    %41 = arith.divf %39, %40 : vector<8x128xf32>
    %42 = arith.mulf %35, %41 : vector<8x128xf32>
    %c40 = arith.constant 40 : index
    %c0_20 = arith.constant 0 : index
    %43 = vector.load %arg12[%c40, %c0_20] : memref<48x128xf32, #tpu.memory_space<vmem>>, vector<8x128xf32>
    tpu.vector_store %arg12[%c40, %c0_20], %42 {strides = array<i32>} : memref<48x128xf32, #tpu.memory_space<vmem>>, vector<8x128xf32>,
    %c0_i32 = arith.constant 0 : i32
    %44 = arith.cmpi eq, %arg1, %c0_i32 : i32
    %c1_i32 = arith.constant 1 : i32
    %45 = arith.addi %arg1, %c1_i32 : i32
    %c32_i32 = arith.constant 32 : i32
    %46 = arith.muli %45, %c32_i32 : i32
    %c8_i32 = arith.constant 8 : i32
    %47 = arith.addi %46, %c8_i32 : i32
    %c40_i32 = arith.constant 40 : i32
    %48 = arith.cmpi sgt, %47, %c40_i32 : i32
    %49 = arith.ori %44, %48 : i1
    %50 = arith.extui %49 : i1 to i32
    %c0_i32_21 = arith.constant 0 : i32
    %51 = arith.cmpi ne, %50, %c0_i32_21 : i32
    scf.if %51 {
      %142 = tpu.iota {dimensions = array<i32: 0>} : vector<48x1xi32>
      %c32_i32_52 = arith.constant 32 : i32
      %143 = arith.muli %arg1, %c32_i32_52 : i32
      %c8_i32_53 = arith.constant 8 : i32
      %144 = arith.subi %143, %c8_i32_53 : i32
      %145 = vector.broadcast %144 : i32 to vector<48x1xi32>
      %146 = arith.addi %142, %145 : vector<48x1xi32>
      %c0_i32_54 = arith.constant 0 : i32
      %147 = vector.broadcast %c0_i32_54 : i32 to vector<48x1xi32>
      %148 = arith.cmpi sge, %146, %147 : vector<48x1xi32>
      %c40_i32_55 = arith.constant 40 : i32
      %149 = vector.broadcast %c40_i32_55 : i32 to vector<48x1xi32>
      %150 = arith.cmpi slt, %146, %149 : vector<48x1xi32>
      %151 = arith.andi %148, %150 : vector<48x1xi1>
      %c0_56 = arith.constant 0 : index
      %c0_57 = arith.constant 0 : index
      %152 = vector.load %arg12[%c0_56, %c0_57] : memref<48x128xf32, #tpu.memory_space<vmem>>, vector<48x128xf32>
      %cst_58 = arith.constant 0.000000e+00 : f32
      %153 = vector.shape_cast %151 : vector<48x1xi1> to vector<48x1xi1>
      %154 = vector.broadcast %153 : vector<48x1xi1> to vector<48x128xi1>
      %155 = vector.broadcast %cst_58 : f32 to vector<48x128xf32>
      %156 = arith.select %154, %152, %155 : vector<48x128xi1>, vector<48x128xf32>
      %c0_59 = arith.constant 0 : index
      %c0_60 = arith.constant 0 : index
      %157 = vector.load %arg12[%c0_59, %c0_60] : memref<48x128xf32, #tpu.memory_space<vmem>>, vector<48x128xf32>
      tpu.vector_store %arg12[%c0_59, %c0_60], %156 {strides = array<i32>} : memref<48x128xf32, #tpu.memory_space<vmem>>, vector<48x128xf32>,
    } else {
    }
    %c0_22 = arith.constant 0 : index
    %c0_23 = arith.constant 0 : index
    %52 = vector.load %arg7[%c0_22, %c0_23] : memref<15x128xf32, #tpu.memory_space<vmem>>, vector<15x128xf32>
    %cst_24 = arith.constant 0.000000e+00 : f32
    %53 = vector.broadcast %cst_24 : f32 to vector<32x128xf32>
    %c1 = arith.constant 1 : index
    %c0_25 = arith.constant 0 : index
    %54 = vector.load %arg12[%c1, %c0_25] : memref<48x128xf32, #tpu.memory_space<vmem>>, vector<32x128xf32>
    %55 = vector.extract_strided_slice %52 {offsets = [0, 0], sizes = [1, 128], strides = [1, 1]} : vector<15x128xf32> to vector<1x128xf32>
    %56 = vector.broadcast %55 : vector<1x128xf32> to vector<32x128xf32>
    %57 = arith.mulf %54, %56 : vector<32x128xf32>
    %58 = arith.addf %53, %57 : vector<32x128xf32>
    %c2 = arith.constant 2 : index
    %c0_26 = arith.constant 0 : index
    %59 = vector.load %arg12[%c2, %c0_26] : memref<48x128xf32, #tpu.memory_space<vmem>>, vector<32x128xf32>
    %60 = vector.extract_strided_slice %52 {offsets = [1, 0], sizes = [1, 128], strides = [1, 1]} : vector<15x128xf32> to vector<1x128xf32>
    %61 = vector.broadcast %60 : vector<1x128xf32> to vector<32x128xf32>
    %62 = arith.mulf %59, %61 : vector<32x128xf32>
    %63 = arith.addf %58, %62 : vector<32x128xf32>
    %c3 = arith.constant 3 : index
    %c0_27 = arith.constant 0 : index
    %64 = vector.load %arg12[%c3, %c0_27] : memref<48x128xf32, #tpu.memory_space<vmem>>, vector<32x128xf32>
    %65 = vector.extract_strided_slice %52 {offsets = [2, 0], sizes = [1, 128], strides = [1, 1]} : vector<15x128xf32> to vector<1x128xf32>
    %66 = vector.broadcast %65 : vector<1x128xf32> to vector<32x128xf32>
    %67 = arith.mulf %64, %66 : vector<32x128xf32>
    %68 = arith.addf %63, %67 : vector<32x128xf32>
    %c4 = arith.constant 4 : index
    %c0_28 = arith.constant 0 : index
    %69 = vector.load %arg12[%c4, %c0_28] : memref<48x128xf32, #tpu.memory_space<vmem>>, vector<32x128xf32>
    %70 = vector.extract_strided_slice %52 {offsets = [3, 0], sizes = [1, 128], strides = [1, 1]} : vector<15x128xf32> to vector<1x128xf32>
    %71 = vector.broadcast %70 : vector<1x128xf32> to vector<32x128xf32>
    %72 = arith.mulf %69, %71 : vector<32x128xf32>
    %73 = arith.addf %68, %72 : vector<32x128xf32>
    %c5 = arith.constant 5 : index
    %c0_29 = arith.constant 0 : index
    %74 = vector.load %arg12[%c5, %c0_29] : memref<48x128xf32, #tpu.memory_space<vmem>>, vector<32x128xf32>
    %75 = vector.extract_strided_slice %52 {offsets = [4, 0], sizes = [1, 128], strides = [1, 1]} : vector<15x128xf32> to vector<1x128xf32>
    %76 = vector.broadcast %75 : vector<1x128xf32> to vector<32x128xf32>
    %77 = arith.mulf %74, %76 : vector<32x128xf32>
    %78 = arith.addf %73, %77 : vector<32x128xf32>
    %c6 = arith.constant 6 : index
    %c0_30 = arith.constant 0 : index
    %79 = vector.load %arg12[%c6, %c0_30] : memref<48x128xf32, #tpu.memory_space<vmem>>, vector<32x128xf32>
    %80 = vector.extract_strided_slice %52 {offsets = [5, 0], sizes = [1, 128], strides = [1, 1]} : vector<15x128xf32> to vector<1x128xf32>
    %81 = vector.broadcast %80 : vector<1x128xf32> to vector<32x128xf32>
    %82 = arith.mulf %79, %81 : vector<32x128xf32>
    %83 = arith.addf %78, %82 : vector<32x128xf32>
    %c7 = arith.constant 7 : index
    %c0_31 = arith.constant 0 : index
    %84 = vector.load %arg12[%c7, %c0_31] : memref<48x128xf32, #tpu.memory_space<vmem>>, vector<32x128xf32>
    %85 = vector.extract_strided_slice %52 {offsets = [6, 0], sizes = [1, 128], strides = [1, 1]} : vector<15x128xf32> to vector<1x128xf32>
    %86 = vector.broadcast %85 : vector<1x128xf32> to vector<32x128xf32>
    %87 = arith.mulf %84, %86 : vector<32x128xf32>
    %88 = arith.addf %83, %87 : vector<32x128xf32>
    %c8_32 = arith.constant 8 : index
    %c0_33 = arith.constant 0 : index
    %89 = vector.load %arg12[%c8_32, %c0_33] : memref<48x128xf32, #tpu.memory_space<vmem>>, vector<32x128xf32>
    %90 = vector.extract_strided_slice %52 {offsets = [7, 0], sizes = [1, 128], strides = [1, 1]} : vector<15x128xf32> to vector<1x128xf32>
    %91 = vector.broadcast %90 : vector<1x128xf32> to vector<32x128xf32>
    %92 = arith.mulf %89, %91 : vector<32x128xf32>
    %93 = arith.addf %88, %92 : vector<32x128xf32>
    %c9 = arith.constant 9 : index
    %c0_34 = arith.constant 0 : index
    %94 = vector.load %arg12[%c9, %c0_34] : memref<48x128xf32, #tpu.memory_space<vmem>>, vector<32x128xf32>
    %95 = vector.extract_strided_slice %52 {offsets = [8, 0], sizes = [1, 128], strides = [1, 1]} : vector<15x128xf32> to vector<1x128xf32>
    %96 = vector.broadcast %95 : vector<1x128xf32> to vector<32x128xf32>
    %97 = arith.mulf %94, %96 : vector<32x128xf32>
    %98 = arith.addf %93, %97 : vector<32x128xf32>
    %c10 = arith.constant 10 : index
    %c0_35 = arith.constant 0 : index
    %99 = vector.load %arg12[%c10, %c0_35] : memref<48x128xf32, #tpu.memory_space<vmem>>, vector<32x128xf32>
    %100 = vector.extract_strided_slice %52 {offsets = [9, 0], sizes = [1, 128], strides = [1, 1]} : vector<15x128xf32> to vector<1x128xf32>
    %101 = vector.broadcast %100 : vector<1x128xf32> to vector<32x128xf32>
    %102 = arith.mulf %99, %101 : vector<32x128xf32>
    %103 = arith.addf %98, %102 : vector<32x128xf32>
    %c11 = arith.constant 11 : index
    %c0_36 = arith.constant 0 : index
    %104 = vector.load %arg12[%c11, %c0_36] : memref<48x128xf32, #tpu.memory_space<vmem>>, vector<32x128xf32>
    %105 = vector.extract_strided_slice %52 {offsets = [10, 0], sizes = [1, 128], strides = [1, 1]} : vector<15x128xf32> to vector<1x128xf32>
    %106 = vector.broadcast %105 : vector<1x128xf32> to vector<32x128xf32>
    %107 = arith.mulf %104, %106 : vector<32x128xf32>
    %108 = arith.addf %103, %107 : vector<32x128xf32>
    %c12 = arith.constant 12 : index
    %c0_37 = arith.constant 0 : index
    %109 = vector.load %arg12[%c12, %c0_37] : memref<48x128xf32, #tpu.memory_space<vmem>>, vector<32x128xf32>
    %110 = vector.extract_strided_slice %52 {offsets = [11, 0], sizes = [1, 128], strides = [1, 1]} : vector<15x128xf32> to vector<1x128xf32>
    %111 = vector.broadcast %110 : vector<1x128xf32> to vector<32x128xf32>
    %112 = arith.mulf %109, %111 : vector<32x128xf32>
    %113 = arith.addf %108, %112 : vector<32x128xf32>
    %c13 = arith.constant 13 : index
    %c0_38 = arith.constant 0 : index
    %114 = vector.load %arg12[%c13, %c0_38] : memref<48x128xf32, #tpu.memory_space<vmem>>, vector<32x128xf32>
    %115 = vector.extract_strided_slice %52 {offsets = [12, 0], sizes = [1, 128], strides = [1, 1]} : vector<15x128xf32> to vector<1x128xf32>
    %116 = vector.broadcast %115 : vector<1x128xf32> to vector<32x128xf32>
    %117 = arith.mulf %114, %116 : vector<32x128xf32>
    %118 = arith.addf %113, %117 : vector<32x128xf32>
    %c14 = arith.constant 14 : index
    %c0_39 = arith.constant 0 : index
    %119 = vector.load %arg12[%c14, %c0_39] : memref<48x128xf32, #tpu.memory_space<vmem>>, vector<32x128xf32>
    %120 = vector.extract_strided_slice %52 {offsets = [13, 0], sizes = [1, 128], strides = [1, 1]} : vector<15x128xf32> to vector<1x128xf32>
    %121 = vector.broadcast %120 : vector<1x128xf32> to vector<32x128xf32>
    %122 = arith.mulf %119, %121 : vector<32x128xf32>
    %123 = arith.addf %118, %122 : vector<32x128xf32>
    %c15 = arith.constant 15 : index
    %c0_40 = arith.constant 0 : index
    %124 = vector.load %arg12[%c15, %c0_40] : memref<48x128xf32, #tpu.memory_space<vmem>>, vector<32x128xf32>
    %125 = vector.extract_strided_slice %52 {offsets = [14, 0], sizes = [1, 128], strides = [1, 1]} : vector<15x128xf32> to vector<1x128xf32>
    %126 = vector.broadcast %125 : vector<1x128xf32> to vector<32x128xf32>
    %127 = arith.mulf %124, %126 : vector<32x128xf32>
    %128 = arith.addf %123, %127 : vector<32x128xf32>
    %c0_41 = arith.constant 0 : index
    %c0_42 = arith.constant 0 : index
    %129 = vector.load %arg8[%c0_41, %c0_42] : memref<1x128xf32, #tpu.memory_space<vmem>>, vector<1x128xf32>
    %130 = vector.broadcast %129 : vector<1x128xf32> to vector<32x128xf32>
    %131 = arith.addf %128, %130 : vector<32x128xf32>
    %cst_43 = arith.constant 0.000000e+00 : f32
    %132 = vector.broadcast %cst_43 : f32 to vector<32x128xf32>
    %133 = arith.maximumf %131, %132 : vector<32x128xf32>
    %c0_44 = arith.constant 0 : index
    %c0_45 = arith.constant 0 : index
    %134 = vector.load %arg9[%c0_44, %c0_45] : memref<128x128xf32, #tpu.memory_space<vmem>>, vector<128x128xf32>
    %cst_46 = arith.constant dense<0.000000e+00> : vector<32x128xf32>
    %135 = tpu.matmul %133, %134, %cst_46 {dimension_numbers = #tpu.dot_dimension_numbers<[1], [0], [0], [1], [0, 0, 1, 1], [], []>} : vector<32x128xf32>, vector<128x128xf32>, vector<32x128xf32> -> vector<32x128xf32>
    %c0_47 = arith.constant 0 : index
    %c0_48 = arith.constant 0 : index
    %136 = vector.load %arg10[%c0_47, %c0_48] : memref<1x128xf32, #tpu.memory_space<vmem>>, vector<1x128xf32>
    %137 = vector.broadcast %136 : vector<1x128xf32> to vector<32x128xf32>
    %138 = arith.addf %135, %137 : vector<32x128xf32>
    %c0_49 = arith.constant 0 : index
    %c0_50 = arith.constant 0 : index
    %c0_51 = arith.constant 0 : index
    %139 = vector.load %arg11[%c0_49, %c0_50, %c0_51] : memref<1x32x128xf32, #tpu.memory_space<vmem>>, vector<1x32x128xf32>
    %140 = vector.shape_cast %139 : vector<1x32x128xf32> to vector<32x128xf32>
    %141 = vector.shape_cast %138 : vector<32x128xf32> to vector<1x32x128xf32>
    tpu.vector_store %arg11[%c0_49, %c0_50, %c0_51], %141 {strides = array<i32>} : memref<1x32x128xf32, #tpu.memory_space<vmem>>, vector<1x32x128xf32>,
    return
  }
  func.func @transform_0(%arg0: i32, %arg1: i32) -> (i32, i32, i32) {
    %c0_i32 = arith.constant 0 : i32
    %c0_i32_0 = arith.constant 0 : i32
    return %arg0, %arg1, %c0_i32 : i32, i32, i32
  }
  func.func @transform_1(%arg0: i32, %arg1: i32) -> (i32, i32, i32) {
    %c4_i32 = arith.constant 4 : i32
    %0 = arith.muli %arg1, %c4_i32 : i32
    %c1_i32 = arith.constant 1 : i32
    %1 = arith.subi %0, %c1_i32 : i32
    %c0_i32 = arith.constant 0 : i32
    %2 = arith.maxsi %1, %c0_i32 : i32
    %c0_i32_0 = arith.constant 0 : i32
    %c0_i32_1 = arith.constant 0 : i32
    return %arg0, %2, %c0_i32_0 : i32, i32, i32
  }
  func.func @transform_2(%arg0: i32, %arg1: i32) -> (i32, i32, i32) {
    %c1_i32 = arith.constant 1 : i32
    %0 = arith.addi %arg1, %c1_i32 : i32
    %c4_i32 = arith.constant 4 : i32
    %1 = arith.muli %0, %c4_i32 : i32
    %c7_i32 = arith.constant 7 : i32
    %2 = arith.minsi %1, %c7_i32 : i32
    %c0_i32 = arith.constant 0 : i32
    %c0_i32_0 = arith.constant 0 : i32
    return %arg0, %2, %c0_i32 : i32, i32, i32
  }
  func.func @transform_3(%arg0: i32, %arg1: i32) -> (i32, i32) {
    %c0_i32 = arith.constant 0 : i32
    %c0_i32_0 = arith.constant 0 : i32
    %c0_i32_1 = arith.constant 0 : i32
    return %c0_i32, %c0_i32_0 : i32, i32
  }
  func.func @transform_4(%arg0: i32, %arg1: i32) -> (i32, i32) {
    %c0_i32 = arith.constant 0 : i32
    %c0_i32_0 = arith.constant 0 : i32
    %c0_i32_1 = arith.constant 0 : i32
    return %c0_i32, %c0_i32_0 : i32, i32
  }
  func.func @transform_5(%arg0: i32, %arg1: i32) -> (i32, i32) {
    %c0_i32 = arith.constant 0 : i32
    %c0_i32_0 = arith.constant 0 : i32
    %c0_i32_1 = arith.constant 0 : i32
    return %c0_i32, %c0_i32_0 : i32, i32
  }
  func.func @transform_6(%arg0: i32, %arg1: i32) -> (i32, i32) {
    %c0_i32 = arith.constant 0 : i32
    %c0_i32_0 = arith.constant 0 : i32
    %c0_i32_1 = arith.constant 0 : i32
    return %c0_i32, %c0_i32_0 : i32, i32
  }
  func.func @transform_7(%arg0: i32, %arg1: i32) -> (i32, i32) {
    %c0_i32 = arith.constant 0 : i32
    %c0_i32_0 = arith.constant 0 : i32
    %c0_i32_1 = arith.constant 0 : i32
    return %c0_i32, %c0_i32_0 : i32, i32
  }
  func.func @transform_8(%arg0: i32, %arg1: i32) -> (i32, i32) {
    %c0_i32 = arith.constant 0 : i32
    %c0_i32_0 = arith.constant 0 : i32
    %c0_i32_1 = arith.constant 0 : i32
    return %c0_i32, %c0_i32_0 : i32, i32
  }
  func.func @transform_9(%arg0: i32, %arg1: i32) -> (i32, i32, i32) {
    %c0_i32 = arith.constant 0 : i32
    %c0_i32_0 = arith.constant 0 : i32
    return %arg0, %arg1, %c0_i32 : i32, i32, i32
  }
}

</mosaic_0001>

<bundles_post_ra>
// kernel: tpu_custom_call.1
= control target key start
LH: loop header
LB: loop body
LE: loop exit
PB: predicated region body
PF: predicated region fallthrough
CT: control target
= control target key end

     0   :  { %s2753_s0 = inlined_call_operand.hbm [shape: f32[2,64,128], index: 0, kind: input, shape index: {}]   ;;  %s2754_s1 = inlined_call_operand.hbm [shape: f32[2,64,128], index: 1, kind: input, shape index: {}]   ;;  %s2755_s2 = inlined_call_operand.hbm [shape: f32[2,64,128], index: 2, kind: input, shape index: {}]   ;;  %s2756_s3 = inlined_call_operand.hbm [shape: f32[128,256], index: 3, kind: input, shape index: {}]   ;;  %s2757_s4 = inlined_call_operand.vmem [shape: f32[1,256], index: 4, kind: input, shape index: {}]   ;;  %s2758_s5 = inlined_call_operand.hbm [shape: f32[15,128], index: 5, kind: input, shape index: {}]   ;;  %s2759_s6 = inlined_call_operand.vmem [shape: f32[1,128], index: 6, kind: input, shape index: {}]   ;;  %s2760_s7 = inlined_call_operand.hbm [shape: f32[128,128], index: 7, kind: input, shape index: {}]   ;;  %s2761_s8 = inlined_call_operand.vmem [shape: f32[1,128], index: 8, kind: input, shape index: {}]   ;;  %s2762_s9 = inlined_call_operand.hbm [shape: f32[2,64,128], index: 9, kind: output, shape index: {}]  }
   0x1   :  { %2781 = sst [smem:[#allocation36_spill]] %s2753_s0 }
   0x2   :  { %2782 = sst [smem:[#allocation37_spill]] %s2754_s1 }
   0x3   :  { %2783 = sst [smem:[#allocation38_spill]] %s2755_s2 }
   0x4   :  { %2784 = sst [smem:[#allocation39_spill]] %s2756_s3 }
   0x5   :  { %2785 = sst [smem:[#allocation40_spill]] %s2757_s4 }
   0x6   :  { %2786 = sst [smem:[#allocation41_spill]] %s2758_s5 }
   0x7   :  { %2787 = sst [smem:[#allocation42_spill]] %s2759_s6 }
   0x8   :  { %2788 = sst [smem:[#allocation43_spill]] %s2760_s7 }
   0x9   :  { %2789 = sst [smem:[#allocation44_spill]] %s2761_s8 }
   0xa   :  { %2790 = sst [smem:[#allocation45_spill]] %s2762_s9 }
   0xb   :  { %14 = vsyncpa [#allocation4], 0 }
   0xc   :  { %16 = vsyncpa [#allocation4 + $0x1], 0 }
   0xd   :  { %17 = vsyncpa [#allocation7], 0 }
   0xe   :  { %19 = vsyncpa [#allocation7 + $0x1], 0 }
   0xf   :  { %20 = vsyncpa [#allocation10], 0 }
  0x10   :  { %21 = vsyncpa [#allocation13], 0 }
  0x11   :  { %22 = vsyncpa [#allocation5], 0 }
  0x12   :  { %24 = vsyncpa [#allocation5 + $0x1], 0  ;;  %s2019_s30 = smov 0   ;;  %s2021_s10 = smov 0  }
  0x13   :  { %s2023_s11 = smov 0   ;;  %s2025_s12 = smov 0  }
  0x14   :  { %s2027_s13 = smov 0   ;;  %s2029_s14 = smov 0  }
  0x15   :  { %s2031_s15 = smov 0   ;;  %s2033_s16 = smov 0  }
  0x16   :  { %s2035_s17 = smov 0   ;;  %s2037_s18 = smov 0  }
  0x17   :  { %s2039_s19 = smov 0   ;;  %s2041_s20 = smov 0  }
  0x18   :  { %s2043_s21 = smov 0   ;;  %s2045_s22 = smov 0  }
  0x19 LB: > { %2791 = sst [smem:[#allocation21_spill]] %s1906_s30  ;;  %s2090_s23 = sadd.s32 4294967295, %s1958_s22   ;;  %s1958_s22 = sphi %s2045_s22, %s30_s22   ;;  %s1954_s21 = sphi %s2043_s21, %s2863_s21   ;;  %s1950_s20 = sphi %s2041_s20, %s2862_s20   ;;  %s1946_s19 = sphi %s2039_s19, %s2852_s19   ;;  %s1942_s18 = sphi %s2037_s18, %s2851_s18   ;;  %s1938_s17 = sphi %s2035_s17, %s2850_s17   ;;  %s1934_s16 = sphi %s2033_s16, %s2861_s16   ;;  %s1930_s15 = sphi %s2031_s15, %s2860_s15   ;;  %s1926_s14 = sphi %s2029_s14, %s2859_s14   ;;  %s1922_s13 = sphi %s2027_s13, %s2858_s13   ;;  %s1918_s12 = sphi %s2025_s12, %s2857_s12   ;;  %s1914_s11 = sphi %s2023_s11, %s2856_s11   ;;  %s1910_s10 = sphi %s2021_s10, %s2855_s10   ;;  %s1906_s30 = sphi %s2019_s30, %s2846_s30  }
  0x1a   : > { %2792 = sst [smem:[#allocation22_spill]] %s1910_s10  ;;  %p1352_p0 = scmp.ge.s32.totalorder %s1958_s22, 1 }
  0x1b   : > { %2793 = sst [smem:[#allocation23_spill]] %s1922_s13  ;;  %p65_p1 = scmp.eq.s32.totalorder %s2090_s23, 0 }
  0x1c   : > { %2794 = sst [smem:[#allocation24_spill]] %s1938_s17  ;;  %p301_p2 = scmp.lt.s32.totalorder %s1958_s22, 5 }
  0x1d   : > { %2795 = sst [smem:[#allocation25_spill]] %s1942_s18  ;;  %s1960_s28 = smov [#allocation9]  }
  0x1e   : > { %2796 = sst [smem:[#allocation26_spill]] %s1946_s19  ;;  %p2098_p3 = pnand %p1352_p0, %p301_p2 }
  0x1f   : > { %2797 = sst [smem:[#allocation27_spill]] %s1950_s20  ;;  %s314_s29 = sshll.u32 %s1960_s28, 4  ;;  %s315_s29 = int_to_ptr.vmem [resolvable:$true] %s314_s29 }
  0x20   : > { %2798 = sst [smem:[#allocation28_spill]] %s1954_s21  ;;  %p1437_p4 = pneg %p2098_p3 }
  0x21   : > { %s2799_s3 = sld [smem:[#allocation39_spill]]  ;;  %s1961_s24 = smov 256  }
  0x22   : > { %s2800_s27 = scalar_select %p2098_p3, 1, 0 }
  0x23   : > { %p2106_p5 = pnand %p1437_p4, %p65_p1  ;;  %s1962_s25 = smov 16  }
  0x24   : > { %2801 = sst [smem:[#allocation29_spill]] %s2800_s27  ;;  %s42_s8 = sadd.s32 1, %s1954_s21 }
  0x25   : > { %p59_p7 = scmp.eq.s32.totalorder %s1958_s22, 0  ;;  %s2116_s19 = sshll.u32 %s1950_s20, 2 }
  0x26   : > { %p94_p12 = scmp.ne.s32.totalorder %s1926_s14, %s1922_s13  ;;  %p100_p0 = scmp.ne.s32.totalorder %s1922_s13, %s1918_s12 }
  0x27   : > { %s312_s26 = sshll.u32 %s2799_s3, 4  ;;  %s39_s3 = sadd.s32 1, %s1950_s20  ;;  %s313_s26 = int_to_ptr.hbm [resolvable:$true] %s312_s26 }
  0x28   : > { %1440 = dma.hbm_to_vmem [thread:$0]  (!%p2106_p5), %s313_s26, 4096, %s315_s29, [#allocation10], %s1961_s24, %s1961_s24, %s1962_s25  }
  0x29   : > { %p40_p6 = scmp.ge.s32.totalorder %s39_s3, 2  ;;  %s1347_s26 = sadd.s32 4294967295, %s2116_s19 }
  0x2a   : > { %p76_p9 = scmp.gt.s32.totalorder %s1347_s26, 0  ;;  %s87_s24 = sadd.s32 1, %s1926_s14 }
  0x2b   : > { %s2865_s3 = smov (%p40_p6, %s39_s3), 0  ;;  %s2867_s8 = smov (!%p40_p6, %s42_s8), %s1954_s21 }
  0x2c   : > { %2803 = sst [smem:[#allocation30_spill]] %s2865_s3  ;;  %s47_s28 = ssub.s32 %s1950_s20, %s2865_s3 }
  0x2d   : > { %p44_p8 = scmp.ge.s32.totalorder %s2867_s8, 2  ;;  %s1348_s29 = sshll.u32 %s2865_s3, 2 }
  0x2e   : > { %s2871_s26 = smov (!%p76_p9, %s1347_s26), 0  ;;  %s1349_s6 = sadd.s32 4294967295, %s1348_s29 }
  0x2f   : > { %s2869_s8 = smov (%p44_p8, %s2867_s8), 0  ;;  %p80_p10 = scmp.gt.s32.totalorder %s1349_s6, 0 }
  0x30   : > { %2804 = sst [smem:[#allocation31_spill]] %s2869_s8  ;;  %s2130_s25 = ssub.s32 %s1954_s21, %s2869_s8 }
  0x31   : > { %2805 = sst [smem:[#allocation32_spill]] %s2130_s25  ;;  %s2133_s20 = sor.u32 %s47_s28, %s2130_s25 }
  0x32   : > { %p49_p11 = scmp.eq.s32.totalorder %s2133_s20, 0  ;;  %s2873_s6 = smov (!%p80_p10, %s1349_s6), 0 }
  0x33   : > { %p2140_p13 = por %p94_p12, %p59_p7  ;;  %s83_s8 = ssub.s32 %s2871_s26, %s2873_s6 }
  0x34   : > { %s2146_s4 = sadd.s32 4, %s1348_s29  ;;  %s84_s28 = sor.u32 %s83_s8, %s2130_s25 }
  0x35   : > { %2807 = sst [smem:[#allocation33_spill]] %s2146_s4  ;;  %p2151_p2 = por %p100_p0, %p65_p1 }
  0x36   : > { %p85_p4 = scmp.eq.s32.totalorder %s84_s28, 0  ;;  %p116_p6 = scmp.lt.s32.totalorder %s2146_s4, 7 }
  0x37   : > { %s2808_s18 = scalar_select %p2151_p2, 1, 0 }
  0x38   : > { %p2780_p8 = scmp.lt.s32.totalorder %s1958_s22, 4  ;;  %s2158_s27 = sshll.u32 %s1954_s21, 3 }
  0x39   : > { %2809 = sst [smem:[#allocation34_spill]] %s2808_s18  ;;  %s389_s29 = sand.u32 1, %s1958_s22  }
  0x3a   : > { %s2161_s12 = scalar_select %p85_p4, %s1926_s14, %s87_s24  }
  0x3b   : > { %s391_s13 = sand.u32 1, %s1926_s14   ;;  %s401_s2 = sadd.s32 %s2158_s27, %s2871_s26 }
  0x3c   : > { %s1361_s8 = sshll.u32 %s391_s13, 3  ;;  %s1365_s25 = sshll.u32 %s401_s2, 3 }
  0x3d   : > { %s2810_s1 = sld [smem:[#allocation37_spill]]  ;;  %s393_s18 = scalar_lea.vmem [#allocation6], %s1361_s8 }
  0x3e   : > { %s407_s10 = sshll.u32 %s393_s18, 4  ;;  %p1451_p9 = pnand %p2780_p8, %p2140_p13  ;;  %s408_s10 = int_to_ptr.vmem [resolvable:$true] %s407_s10 }
  0x3f   : > { %s2811_s5 = sld [smem:[#allocation41_spill]]  ;;  %s2178_s2 = scalar_lea.sflag [#allocation7], %s389_s29 }
  0x40   : > { %s1963_s0 = smov [#allocation11]   ;;  %s2776_s30 = smov 128  }
  0x41   : > { %s331_s3 = sshll.u32 %s1963_s0, 4  ;;  %s2777_s18 = smov 8   ;;  %s332_s3 = int_to_ptr.vmem [resolvable:$true] %s331_s3 }
  0x42   : > { %s2812_s7 = sld [smem:[#allocation43_spill]]  ;;  %s1345_s29 = sadd.s32 4294967294, %s1958_s22  }
  0x43   : > { %s403_s28 = scalar_lea.hbm %s2810_s1, %s1365_s25  ;;  %s51_s8 = sadd.s32 1, %s1938_s17 }
  0x44   : > { %s405_s4 = sshll.u32 %s403_s28, 4  ;;  %p58_p10 = scmp.ne.s32.totalorder %s1938_s17, %s1934_s16  ;;  %s406_s4 = int_to_ptr.hbm [resolvable:$true] %s405_s4 }
  0x45   : > { %s329_s13 = sshll.u32 %s2811_s5, 4  ;;  %p64_p13 = scmp.ne.s32.totalorder %s1934_s16, %s1930_s15  ;;  %s330_s13 = int_to_ptr.hbm [resolvable:$true] %s329_s13 }
  0x46   : > { %1453 = dma.hbm_to_vmem [thread:$0]  (!%p1451_p9), %s406_s4, 128, %s408_s10, %s2178_s2  }
  0x47   : > { %1443 = dma.hbm_to_vmem [thread:$0]  (!%p2106_p5), %s330_s13, 256, %s332_s3, [#allocation10], %s2776_s30, %s2776_s30, %s2777_s18  }
  0x48   : > { %s346_s4 = sshll.u32 %s2812_s7, 4  ;;  %s1966_s10 = smov [#allocation12]   ;;  %s347_s4 = int_to_ptr.hbm [resolvable:$true] %s346_s4 }
  0x49   : > { %s348_s6 = sshll.u32 %s1966_s10, 4  ;;  %p2205_p12 = por %p59_p7, %p58_p10  ;;  %s349_s6 = int_to_ptr.vmem [resolvable:$true] %s348_s6 }
  0x4a   : > { %1446 = dma.hbm_to_vmem [thread:$0]  (!%p2106_p5), %s347_s4, 2048, %s349_s6, [#allocation13], %s2776_s30, %s2776_s30, %s2777_s18  }
  0x4b   : > { %s2201_s28 = scalar_select %p49_p11, %s1938_s17, %s51_s8  }
  0x4c   : > { %p288_p0 = scmp.eq.s32.totalorder %s2090_s23, 3  ;;  %p294_p4 = scmp.eq.s32.totalorder %s1345_s29, 3 }
  0x4d   : > { %2813 = sst [smem:[#allocation35_spill]] %s2201_s28  ;;  %p2214_p9 = por %p65_p1, %p64_p13 }
  0x4e   : > { %s365_s13 = sand.u32 1, %s1938_s17   ;;  %p2219_p5 = por %p288_p0, %p58_p10 }
  0x4f   : > { %s2817_s0 = sld [smem:[#allocation33_spill]]  ;;  %p2223_p11 = por %p294_p4, %p64_p13 }
  0x50   : > { %s1357_s26 = sshll.u32 %s365_s13, 5  ;;  %s2819_s25 = sadd.s32 %s2158_s27, %s2116_s19 }
  0x51   : > { %s2820_s4 = sld [smem:[#allocation22_spill]]  ;;  %s1360_s10 = sshll.u32 %s2819_s25, 3 }
  0x52   : > { %s2821_s8 = sld [smem:[#allocation36_spill]]  ;;  %s369_s1 = scalar_lea.vmem [#allocation3], %s1357_s26 }
  0x53   : > { %s2822_s30 = sld [smem:[#allocation21_spill]]  ;;  %s379_s5 = sshll.u32 %s369_s1, 4  ;;  %s380_s5 = int_to_ptr.vmem [resolvable:$true] %s379_s5 }
  0x54   : > { %s2823_s7 = sld [smem:[#allocation32_spill]]  ;;  %p1448_p10 = pnand %p2780_p8, %p2205_p12 }
  0x55   : > { %s366_s28 = scalar_lea.sflag [#allocation4], %s365_s13  ;;  %s2824_s25 = smov 8  }
  0x56   : > { %s2825_s17 = smov 128   ;;  %s123_s26 = sadd.s32 1, %s1914_s11 }
  0x57   : > { %s2875_s0 = smov (!%p116_p6, %s2817_s0), 7  ;;  %p130_p0 = scmp.ne.s32.totalorder %s1914_s11, %s2820_s4 }
  0x58   : > { %s376_s18 = scalar_lea.hbm %s2821_s8, %s1360_s10  ;;  %s1394_s10 = sadd.s32 4, %s2116_s19 }
  0x59   : > { %s377_s21 = sshll.u32 %s376_s18, 4  ;;  %p112_p13 = scmp.lt.s32.totalorder %s1394_s10, 7  ;;  %s378_s21 = int_to_ptr.hbm [resolvable:$true] %s377_s21 }
  0x5a   : > { %1450 = dma.hbm_to_vmem [thread:$0]  (!%p1448_p10), %s378_s21, 512, %s380_s5, %s366_s28, %s2825_s17, %s2825_s17, %s2824_s25  }
  0x5b   : > { %s2877_s10 = smov (!%p112_p13, %s1394_s10), 7  ;;  %p136_p4 = scmp.ne.s32.totalorder %s2820_s4, %s2822_s30 }
  0x5c   : > { %s119_s1 = ssub.s32 %s2877_s10, %s2875_s0  ;;  %s416_s18 = sand.u32 1, %s1914_s11  }
  0x5d   : > { %s120_s24 = sor.u32 %s119_s1, %s2823_s7  ;;  %p2253_p12 = por %p130_p0, %p59_p7 }
  0x5e   : > { %p121_p10 = scmp.eq.s32.totalorder %s120_s24, 0  ;;  %p2259_p8 = por %p136_p4, %p65_p1 }
  0x5f   : > { %s1366_s17 = sshll.u32 %s416_s18, 3  ;;  %s426_s19 = sadd.s32 %s2158_s27, %s2877_s10 }
  0x60   : > { %s2265_s21 = scalar_select %p121_p10, %s1914_s11, %s123_s26  }
  0x61   : > { %s1369_s30 = sshll.u32 %s426_s19, 3  ;;  %s2828_s7 = sld [smem:[#allocation38_spill]] }
  0x62   : > { %s418_s6 = scalar_lea.vmem [#allocation8], %s1366_s17  ;;  %p2829_p7 = scmp.lt.s32.totalorder %s1958_s22, 4 }
  0x63   : > { %s432_s29 = sshll.u32 %s418_s6, 4  ;;  %s2278_s27 = sand.u32 (!%p2098_p3), 1, %s1934_s16   ;;  %s433_s29 = int_to_ptr.vmem [resolvable:$true] %s432_s29 }
  0x64   : > { %p1454_p6 = pnand %p2829_p7, %p2253_p12  ;;  %s1371_s10 = sshll.u32 (!%p2098_p3), %s2278_s27, 5 }
  0x65   : > { %441 = sbr.rel (%p2098_p3) target bundleno = 553 (0x229), region = 56  ;;  %s444_s26 = scalar_lea.sflag (!%p2098_p3), [#allocation4], %s2278_s27 }
  0x66   : > { %s2284_s1 = scalar_lea.vmem (!%p2098_p3), [#allocation3], %s1371_s10 }
  0x67   : > { %s428_s4 = scalar_lea.hbm %s2828_s7, %s1369_s30 }
  0x68   : > { %s430_s8 = sshll.u32 %s428_s4, 4  ;;  %s431_s8 = int_to_ptr.hbm [resolvable:$true] %s430_s8 }
  0x69   : > { %1456 = dma.hbm_to_vmem [thread:$0]  (!%p1454_p6), %s431_s8, 128, %s433_s29, %s2178_s2  }
  0x6a   : > { %1881 = dma.done.wait (%p2214_p9), %s444_s26, 512  }
  0x6b   : > { %1883 = vsyncadd (%p2214_p9), %s444_s26, 4294966784  ;;  %s2831_s2 = sld [smem:[#allocation23_spill]]  ;;  %s453_s24 = sand.u32 1, %s2090_s23  }
  0x6c   : > { %s454_s19 = scalar_lea.sflag [#allocation7], %s453_s24 }
  0x71   : > { %s455_s13 = sand.u32 1, %s2831_s2  }
  0x72   : > { %s2292_s17 = sshll.u32 %s455_s13, 3 }
  0x73   : > { %s457_s30 = scalar_lea.vmem [#allocation6], %s2292_s17 }
  0x74   : > { %1885 = dma.done.wait (%p2151_p2), %s454_s19, 128  }
  0x75   : > { %1887 = vsyncadd (%p2151_p2), %s454_s19, 4294967168  ;;  %s2833_s28 = sld [smem:[#allocation22_spill]] }
  0x7b   : > { %s465_s0 = sand.u32 1, %s2833_s28  }
  0x7c   : > { %s2300_s9 = sshll.u32 %s465_s0, 3 }
  0x7d   : > { %s467_s7 = scalar_lea.vmem [#allocation8], %s2300_s9 }
  0x7e   : > { %1889 = dma.done.wait (%p2259_p8), %s454_s19, 128  }
  0x7f   : > { %1891 = vsyncadd (%p2259_p8), %s454_s19, 4294967168 }
  0x80   : > { %1893 = dma.done.wait (%p65_p1), [#allocation10], 4352  }
  0x81   : > { %1895 = vsyncadd (%p65_p1), [#allocation10], 4294962944 }
  0x82   : > { %1897 = dma.done.wait (%p65_p1), [#allocation13], 2048  }
  0x83   : > { %1899 = vsyncadd (%p65_p1), [#allocation13], 4294965248  ;;  %v2315_v0 = vld [vmem:[#allocation9 + $0xf8] sm:$0xff]  ;;  %v2317_v1 = vld [vmem:[#allocation9 + $0xe8] sm:$0xff]  ;;  %s2834_s23 = sld [smem:[#allocation25_spill]] }
  0x84   : > { %597 = vmatpush.msra.mxu1 %v2315_v0  ;;  %671 = vmatpush.msra.mxu3 %v2315_v0  ;;  %v2321_v2 = vld [vmem:[#allocation9 + $0xd8] sm:$0xff]  ;;  %v2325_v3 = vld [vmem:[#allocation9 + $0xc8] sm:$0xff]  ;;  %v2327_v4 = vld [vmem:[#allocation9 + $0xf0] sm:$0xff]  ;;  %s2836_s26 = sld [smem:[#allocation40_spill]] }
  0x85   : > { %v2331_v5 = vld [vmem:[#allocation9 + $0xe0] sm:$0xff]  ;;  %v2333_v6 = vld [vmem:[#allocation9 + $0xb8] sm:$0xff]  ;;  %577 = vmatpush.msra.mxu0 %v2327_v4  ;;  %642 = vmatpush.msra.mxu2 %v2327_v4  ;;  %v2339_v7 = vld [vmem:[#allocation9 + $0xd0] sm:$0xff] }
  0x86   : > { %598 = vmatpush.msra.mxu1 %v2317_v1  ;;  %672 = vmatpush.msra.mxu3 %v2317_v1  ;;  %v2341_v8 = vld [vmem:[#allocation9 + $0xa8] sm:$0xff]  ;;  %v2347_v9 = vld [vmem:[#allocation9 + $0xc0] sm:$0xff]  ;;  %v2349_v10 = vld [vmem:[#allocation9 + $0x98] sm:$0xff] }
  0x87   : > { %578 = vmatpush.msra.mxu0 %v2331_v5  ;;  %643 = vmatpush.msra.mxu2 %v2331_v5  ;;  %v2355_v11 = vld [vmem:[#allocation9 + $0xb0] sm:$0xff]  ;;  %v2357_v12 = vld [vmem:[#allocation9 + $0x88] sm:$0xff]  ;;  %v2363_v13 = vld [vmem:[#allocation9 + $0xa0] sm:$0xff] }
  0x88   : > { %599 = vmatpush.msra.mxu1 %v2321_v2  ;;  %673 = vmatpush.msra.mxu3 %v2321_v2  ;;  %v2365_v14 = vld [vmem:[#allocation9 + $0x78] sm:$0xff]  ;;  %v2371_v15 = vld [vmem:[#allocation9 + $0x90] sm:$0xff]  ;;  %v2373_v16 = vld [vmem:[#allocation9 + $0x68] sm:$0xff] }
  0x89   : > { %579 = vmatpush.msra.mxu0 %v2339_v7  ;;  %644 = vmatpush.msra.mxu2 %v2339_v7  ;;  %v2379_v17 = vld [vmem:[#allocation9 + $0x80] sm:$0xff]  ;;  %v2381_v18 = vld [vmem:[#allocation9 + $0x58] sm:$0xff]  ;;  %v2387_v19 = vld [vmem:[#allocation9 + $0x70] sm:$0xff]  ;;  %s1399_s5 = sshll.u32 %s2834_s23, 5  ;;  %p846_p1 = scmp.eq.s32.totalorder %s2834_s23, 0 }
  0x8a   : > { %600 = vmatpush.msra.mxu1 %v2325_v3  ;;  %674 = vmatpush.msra.mxu3 %v2325_v3  ;;  %v2389_v20 = vld [vmem:[#allocation9 + $0x48] sm:$0xff]  ;;  %v2395_v21 = vld [vmem:[#allocation9 + $0x60] sm:$0xff]  ;;  %v2397_v22 = vld [vmem:[#allocation9 + $0x38] sm:$0xff]  ;;  %s1400_s4 = sadd.s32 32, %s1399_s5 }
  0x8b   : > { %580 = vmatpush.msra.mxu0 %v2347_v9  ;;  %645 = vmatpush.msra.mxu2 %v2347_v9  ;;  %v2403_v23 = vld [vmem:[#allocation9 + $0x50] sm:$0xff]  ;;  %v2405_v24 = vld [vmem:[#allocation9 + $0x28] sm:$0xff]  ;;  %v2411_v25 = vld [vmem:[#allocation9 + $0x40] sm:$0xff]  ;;  %s849_s6 = sadd.s32 8, %s1400_s4 }
  0x8c   : > { %601 = vmatpush.msra.mxu1 %v2333_v6  ;;  %675 = vmatpush.msra.mxu3 %v2333_v6  ;;  %v541_v26 = vld [vmem:[#allocation9 + $0x18] sm:$0xff]  ;;  %v2417_v27 = vld [vmem:[#allocation9 + $0x30] sm:$0xff]  ;;  %v539_v28 = vld [vmem:[#allocation9 + $0x8] sm:$0xff]  ;;  %p850_p3 = scmp.gt.s32.totalorder %s849_s6, 40 }
  0x8d   : > { %581 = vmatpush.msra.mxu0 %v2355_v11  ;;  %646 = vmatpush.msra.mxu2 %v2355_v11  ;;  %v638_v29 = vld [vmem:[%s2284_s1] sm:$0xff]  ;;  %v540_v32 = vld [vmem:[#allocation9 + $0x10] sm:$0xff]  ;;  %v639_v34 = vld [vmem:[%s2284_s1 + $0x8] sm:$0xff] }
  0x8e   : > { %602 = vmatpush.msra.mxu1 %v2341_v8  ;;  %676 = vmatpush.msra.mxu3 %v2341_v8  ;;  %v571_v30 = vld [vmem:[%s457_s30] sm:$0xff]  ;;  %v640_v35 = vld [vmem:[%s2284_s1 + $0x10] sm:$0xff]  ;;  %v641_v36 = vld [vmem:[%s2284_s1 + $0x18] sm:$0xff]  ;;  %p2462_p2 = por %p850_p3, %p846_p1  ;;  %s2485_s1 = scalar_lea.vmem [#allocation14], %s1371_s10 }
  0x8f   : > { %582 = vmatpush.msra.mxu0 %v2363_v13  ;;  %647 = vmatpush.msra.mxu2 %v2363_v13  ;;  %v542_v31 = vld [vmem:[#allocation9 + $0x20] sm:$0xff]  ;;  %v784_v37 = vld [vmem:[%s467_s7] sm:$0xff]  ;;  %s1386_s18 = sadd.s32 (%p2462_p2), 4294967288, %s1399_s5 }
  0x90   : > { %603 = vmatpush.msra.mxu1 %v2349_v10  ;;  %677 = vmatpush.msra.mxu3 %v2349_v10  ;;  %v538_v33 = vld [vmem:[#allocation9] sm:$0xff]  ;;  %v570_v38 = vld [vmem:[%s2836_s26] sm:$0x3] }
  0x91   : > { %583 = vmatpush.msra.mxu0 %v2371_v15  ;;  %648 = vmatpush.msra.mxu2 %v2371_v15  ;;  %v574_v39 = vperm.slane %v570_v38, 1 }
  0x92   : > { %604 = vmatpush.msra.mxu1 %v2357_v12  ;;  %678 = vmatpush.msra.mxu3 %v2357_v12 }
  0x93   : > { %584 = vmatpush.msra.mxu0 %v2379_v17  ;;  %649 = vmatpush.msra.mxu2 %v2379_v17 }
  0x94   : > { %605 = vmatpush.msra.mxu1 %v2365_v14  ;;  %679 = vmatpush.msra.mxu3 %v2365_v14 }
  0x95   : > { %585 = vmatpush.msra.mxu0 %v2387_v19  ;;  %650 = vmatpush.msra.mxu2 %v2387_v19 }
  0x96   : > { %606 = vmatpush.msra.mxu1 %v2373_v16  ;;  %680 = vmatpush.msra.mxu3 %v2373_v16 }
  0x97   : > { %586 = vmatpush.msra.mxu0 %v2395_v21  ;;  %651 = vmatpush.msra.mxu2 %v2395_v21 }
  0x98   : > { %607 = vmatpush.msra.mxu1 %v2381_v18  ;;  %681 = vmatpush.msra.mxu3 %v2381_v18 }
  0x99   : > { %587 = vmatpush.msra.mxu0 %v2403_v23  ;;  %652 = vmatpush.msra.mxu2 %v2403_v23 }
  0x9a   : > { %608 = vmatpush.msra.mxu1 %v2389_v20  ;;  %682 = vmatpush.msra.mxu3 %v2389_v20 }
  0x9b   : > { %588 = vmatpush.msra.mxu0 %v2411_v25  ;;  %653 = vmatpush.msra.mxu2 %v2411_v25 }
  0x9c   : > { %609 = vmatpush.msra.mxu1 %v2397_v22  ;;  %683 = vmatpush.msra.mxu3 %v2397_v22 }
  0x9d   : > { %589 = vmatpush.msra.mxu0 %v2417_v27  ;;  %654 = vmatpush.msra.mxu2 %v2417_v27 }
  0x9e   : > { %610 = vmatpush.msra.mxu1 %v2405_v24  ;;  %684 = vmatpush.msra.mxu3 %v2405_v24 }
  0x9f   : > { %590 = vmatpush.msra.mxu0 %v542_v31  ;;  %655 = vmatpush.msra.mxu2 %v542_v31 }
  0xa0   : > { %611 = vmatpush.msra.mxu1 %v541_v26  ;;  %685 = vmatpush.msra.mxu3 %v541_v26 }
  0xa1   : > { %591 = vmatpush.msra.mxu0 %v540_v32  ;;  %656 = vmatpush.msra.mxu2 %v540_v32 }
  0xa2   : > { %612 = vmatpush.msra.mxu1 %v539_v28  ;;  %686 = vmatpush.msra.mxu3 %v539_v28 }
  0xa3   : > { %687 = vmatmul.f32.vlgmr.msra.gmra.mxu3 %v638_v29  ;;  %613 = vmatmul.f32.vlgmr.msra.gmra.mxu1 %v571_v30 }
  0xa4   : > { %805 = vmatpush.msrb.mxu1 %v2315_v0  ;;  %592 = vmatpush.msra.mxu0 %v538_v33 }
  0xa5   : > { %657 = vmatpush.msra.mxu2 %v538_v33  ;;  %593 = vmatmul.f32.vlgmr.msra.gmra.mxu0 %v571_v30 }
  0xa6   : > { %806 = vmatpush.msrb.mxu1 %v2317_v1  ;;  %658 = vmatmul.f32.vlgmr.msra.gmra.mxu2 %v638_v29 }
  0xa7   : > { %785 = vmatpush.msrb.mxu0 %v2327_v4 }
  0xa8   : > { %807 = vmatpush.msrb.mxu1 %v2321_v2  ;;  %v2469_v2 = vperm.slane %v570_v38, 0 }
  0xa9   : > { %786 = vmatpush.msrb.mxu0 %v2331_v5 }
  0xaa   : > { %808 = vmatpush.msrb.mxu1 %v2325_v3 }
  0xab   : > { %690 = vmatmul.f32.gmra.mxu3 %v639_v34  ;;  %787 = vmatpush.msrb.mxu0 %v2339_v7 }
  0xac   : > { %809 = vmatpush.msrb.mxu1 %v2333_v6 }
  0xad   : > { %788 = vmatpush.msrb.mxu0 %v2347_v9 }
  0xae   : > { %810 = vmatpush.msrb.mxu1 %v2341_v8  ;;  %661 = vmatmul.f32.gmra.mxu2 %v639_v34 }
  0xaf   : > { %789 = vmatpush.msrb.mxu0 %v2355_v11 }
  0xb0   : > { %811 = vmatpush.msrb.mxu1 %v2349_v10 }
  0xb1   : > { %790 = vmatpush.msrb.mxu0 %v2363_v13 }
  0xb2   : > { %812 = vmatpush.msrb.mxu1 %v2357_v12 }
  0xb3   : > { %693 = vmatmul.f32.gmra.mxu3 %v640_v35  ;;  %791 = vmatpush.msrb.mxu0 %v2371_v15 }
  0xb4   : > { %813 = vmatpush.msrb.mxu1 %v2365_v14 }
  0xb5   : > { %792 = vmatpush.msrb.mxu0 %v2379_v17 }
  0xb6   : > { %814 = vmatpush.msrb.mxu1 %v2373_v16  ;;  %664 = vmatmul.f32.gmra.mxu2 %v640_v35 }
  0xb7   : > { %793 = vmatpush.msrb.mxu0 %v2387_v19 }
  0xb8   : > { %815 = vmatpush.msrb.mxu1 %v2381_v18 }
  0xb9   : > { %794 = vmatpush.msrb.mxu0 %v2395_v21 }
  0xba   : > { %816 = vmatpush.msrb.mxu1 %v2389_v20 }
  0xbb   : > { %696 = vmatmul.f32.gmra.mxu3 %v641_v36  ;;  %795 = vmatpush.msrb.mxu0 %v2403_v23 }
  0xbc   : > { %817 = vmatpush.msrb.mxu1 %v2397_v22 }
  0xbd   : > { %796 = vmatpush.msrb.mxu0 %v2411_v25 }
  0xbe   : > { %818 = vmatpush.msrb.mxu1 %v2405_v24  ;;  %667 = vmatmul.f32.gmra.mxu2 %v641_v36 }
  0xbf   : > { %797 = vmatpush.msrb.mxu0 %v2417_v27 }
  0xc0   : > { %819 = vmatpush.msrb.mxu1 %v541_v26 }
  0xc1   : > { %798 = vmatpush.msrb.mxu0 %v542_v31 }
  0xc2   : > { %820 = vmatpush.msrb.mxu1 %v539_v28 }
  0xc3   : > { %821 = vmatmul.f32.vlgmr.msrb.gmra.mxu1 %v784_v37  ;;  %799 = vmatpush.msrb.mxu0 %v540_v32 }
  0xc5   : > { %800 = vmatpush.msrb.mxu0 %v538_v33 }
  0xc6   : > { %801 = vmatmul.f32.vlgmr.msrb.gmra.mxu0 %v784_v37 }
 0x120   : > { %v614_v40 = vpop.f32.mrf.mxu1 }
 0x121   : > { %v615_v41 = vadd.f32 %v614_v40, %v574_v39 }
 0x122   : > { %v594_v63 = vpop.f32.mrf.mxu0 }
 0x123   : > { %v1378_v42 = vmul.f32 -1.442695, %v615_v41  ;;  %v595_v7 = vadd.f32 %v594_v63, %v2469_v2 }
 0x125   : > { %1590 = vpow2.f32 %v1378_v42 }
 0x126   : > { %v688_v43 = vpop.f32.mrf.mxu3 }
 0x127   : > { %v689_v44 = vadd.f32 %v688_v43, %v574_v39 }
 0x129   : > { %v1379_v45 = vmul.f32 -1.442695, %v689_v44  ;;  %v659_v57 = vpop.f32.mrf.mxu2 }
 0x12a   : > { %v660_v22 = vadd.f32 %v659_v57, %v2469_v2 }
 0x12b   : > { %1592 = vpow2.f32 %v1379_v45  ;;  %v1591_v46 = vpop.eup %1590 }
 0x12c   : > { %v620_v47 = vadd.f32 1.0, %v1591_v46 }
 0x12e   : > { %v691_v48 = vpop.f32.mrf.mxu3  ;;  %1594 = vrcp.f32 %v620_v47  ;;  %v632_v58 = vand.u32 2147483648, %v620_v47  ;;  %vm626_vm0 = vweird.f32 %v620_v47  ;;  %v630_v60 = vand.u32 2147483647, %v620_v47 }
 0x12f   : > { %v692_v49 = vadd.f32 %v691_v48, %v574_v39 }
 0x130   : > { %v633_v6 = vor.u32 1.1754944e-38, %v632_v58  ;;  %vm631_vm3 = vcmp.eq.f32.partialorder %v630_v60, 8.507059e+37 }
 0x131   : > { %v1593_v50 = vpop.eup %1592  ;;  %v1380_v51 = vmul.f32 -1.442695, %v692_v49  ;;  %v662_v24 = vpop.f32.mrf.mxu2 }
 0x132   : > { %v712_v52 = vadd.f32 1.0, %v1593_v50  ;;  %v663_v38 = vadd.f32 %v662_v24, %v2469_v2 }
 0x133   : > { %1596 = vpow2.f32 %v1380_v51 }
 0x134   : > { %1598 = vrcp.f32 %v712_v52  ;;  %v1595_v53 = vpop.eup %1594  ;;  %v725_v11 = vand.u32 2147483647, %v712_v52  ;;  %v727_v12 = vand.u32 2147483648, %v712_v52  ;;  %vm721_vm5 = vweird.f32 %v712_v52 }
 0x135   : > { %v622_v55 = vmul.f32 %v1595_v53, %v620_v47  ;;  %vm627_vm1 = vweird.f32 %v1595_v53 }
 0x136   : > { %v694_v54 = vpop.f32.mrf.mxu3  ;;  %vm2471_vm2 = vmor %vm626_vm0, %vm627_vm1  ;;  %v728_v28 = vor.u32 1.1754944e-38, %v727_v12  ;;  %vm726_vm7 = vcmp.eq.f32.partialorder %v725_v11, 8.507059e+37 }
 0x137   : > { %v695_v56 = vadd.f32 %v694_v54, %v574_v39  ;;  %v623_v59 = vsub.f32 1.0, %v622_v55 }
 0x139   : > { %v1597_v61 = vpop.eup %1596  ;;  %v1381_v62 = vmul.f32 -1.442695, %v695_v56  ;;  %v624_v3 = vmul.f32 %v1595_v53, %v623_v59  ;;  %v665_v45 = vpop.f32.mrf.mxu2 }
 0x13a   : > { %v1599_v0 = vpop.eup %1598  ;;  %v713_v1 = vadd.f32 1.0, %v1597_v61  ;;  %v666_v54 = vadd.f32 %v665_v45, %v2469_v2 }
 0x13b   : > { %1600 = vpow2.f32 %v1381_v62  ;;  %v717_v4 = vmul.f32 %v1599_v0, %v712_v52  ;;  %v625_v8 = vadd.f32 %v1595_v53, %v624_v3  ;;  %vm722_vm4 = vweird.f32 %v1599_v0 }
 0x13c   : > { %1602 = vrcp.f32 %v713_v1  ;;  %vm723_vm6 = vmor %vm721_vm5, %vm722_vm4  ;;  %v742_v34 = vand.u32 2147483648, %v713_v1  ;;  %v740_v36 = vand.u32 2147483647, %v713_v1  ;;  %vm736_vm9 = vweird.f32 %v713_v1 }
 0x13d   : > { %v718_v9 = vsub.f32 1.0, %v717_v4  ;;  %v629_v13 = vsel %vm2471_vm2, %v1595_v53, %v625_v8 }
 0x13e   : > { %v697_v10 = vpop.f32.mrf.mxu3  ;;  %v634_v17 = vsel %vm631_vm3, %v633_v6, %v629_v13  ;;  %v743_v42 = vor.u32 1.1754944e-38, %v742_v34  ;;  %vm741_vm11 = vcmp.eq.f32.partialorder %v740_v36, 8.507059e+37 }
 0x13f   : > { %v698_v14 = vadd.f32 %v697_v10, %v574_v39  ;;  %v719_v16 = vmul.f32 %v1599_v0, %v718_v9  ;;  %v636_v19 = vmul.f32 %v634_v17, %v595_v7 }
 0x140   : > { %v822_v15 = vpop.f32.mrf.mxu1 }
 0x141   : > { %v823_v18 = vadd.f32 %v822_v15, %v574_v39  ;;  %v1601_v20 = vpop.eup %1600  ;;  %v1382_v21 = vmul.f32 -1.442695, %v698_v14  ;;  %v720_v23 = vadd.f32 %v1599_v0, %v719_v16  ;;  %637 = vst [vmem:[#allocation2] sm:$0xff] %v636_v19  ;;  %v668_v63 = vpop.f32.mrf.mxu2 }
 0x142   : > { %v1603_v25 = vpop.eup %1602  ;;  %v714_v26 = vadd.f32 1.0, %v1601_v20  ;;  %v669_v8 = vadd.f32 %v668_v63, %v2469_v2 }
 0x143   : > { %v1383_v27 = vmul.f32 -1.442695, %v823_v18  ;;  %1604 = vpow2.f32 %v1382_v21  ;;  %v724_v29 = vsel %vm723_vm6, %v1599_v0, %v720_v23  ;;  %v732_v30 = vmul.f32 %v1603_v25, %v713_v1  ;;  %v802_v6 = vpop.f32.mrf.mxu0 }
 0x144   : > { %1606 = vrcp.f32 %v714_v26  ;;  %v729_v31 = vsel %vm726_vm7, %v728_v28, %v724_v29  ;;  %vm737_vm8 = vweird.f32 %v1603_v25  ;;  %v757_v51 = vand.u32 2147483648, %v714_v26 }
 0x145   : > { %1608 = vpow2.f32 %v1383_v27  ;;  %v776_v32 = vmul.f32 %v729_v31, %v660_v22  ;;  %v733_v33 = vsub.f32 1.0, %v732_v30  ;;  %vm738_vm10 = vmor %vm736_vm9, %vm737_vm8  ;;  %v755_v53 = vand.u32 2147483647, %v714_v26 }
 0x146   : > { %vm751_vm13 = vweird.f32 %v714_v26  ;;  %v758_v57 = vor.u32 1.1754944e-38, %v757_v51  ;;  %v803_v14 = vadd.f32 %v802_v6, %v2469_v2  ;;  %v855_v2 = vlaneseq (%p2462_p2) }
 0x147   : > { %780 = vst [vmem:[#allocation2 + $0x8] sm:$0xff] %v776_v32  ;;  %v734_v35 = vmul.f32 %v1603_v25, %v733_v33  ;;  %vm756_vm15 = vcmp.eq.f32.partialorder %v755_v53, 8.507059e+37  ;;  %v864_v23 = vstv (%p2462_p2), %s1386_s18 }
 0x148   : > { %v856_v24 = vshrl.u32 (%p2462_p2), %v855_v2, 7  ;;  %v889_v29 = vld [vmem:[#allocation2] sm:$0xff] (%p2462_p2) }
 0x149   : > { %v1605_v37 = vpop.eup %1604  ;;  %v735_v39 = vadd.f32 %v1603_v25, %v734_v35 }
 0x14a   : > { %v1607_v40 = vpop.eup %1606  ;;  %v715_v41 = vadd.f32 1.0, %v1605_v37  ;;  %v858_v27 = vadd.s32 (%p2462_p2), 16, %v856_v24  ;;  %v859_v28 = vadd.s32 (%p2462_p2), 24, %v856_v24  ;;  %v860_v30 = vadd.s32 (%p2462_p2), 32, %v856_v24 }
 0x14b   : > { %v1609_v43 = vpop.eup %1608  ;;  %v739_v44 = vsel %vm738_vm10, %v1603_v25, %v735_v39  ;;  %v747_v46 = vmul.f32 %v1607_v40, %v714_v26  ;;  %vm752_vm12 = vweird.f32 %v1607_v40  ;;  %v865_v25 = vadd.s32 (%p2462_p2), %v864_v23, %v856_v24 }
 0x14c   : > { %1610 = vrcp.f32 %v715_v41  ;;  %v828_v47 = vadd.f32 1.0, %v1609_v43  ;;  %v744_v48 = vsel %vm741_vm11, %v743_v42, %v739_v44  ;;  %vm753_vm14 = vmor %vm751_vm13, %vm752_vm12  ;;  %v772_v3 = vand.u32 2147483648, %v715_v41 }
 0x14d   : > { %v777_v49 = vmul.f32 %v744_v48, %v663_v38  ;;  %v748_v50 = vsub.f32 1.0, %v747_v46  ;;  %v770_v5 = vand.u32 2147483647, %v715_v41  ;;  %vm766_vm1 = vweird.f32 %v715_v41 }
 0x14e   : > { %1612 = vrcp.f32 %v828_v47  ;;  %v840_v9 = vand.u32 2147483648, %v828_v47  ;;  %v838_v12 = vand.u32 2147483647, %v828_v47  ;;  %v773_v13 = vor.u32 1.1754944e-38, %v772_v3  ;;  %v890_v34 = vld [vmem:[#allocation2 + $0x8] sm:$0xff] (%p2462_p2) }
 0x14f   : > { %781 = vst [vmem:[#allocation2 + $0x10] sm:$0xff] %v777_v49  ;;  %v749_v52 = vmul.f32 %v1607_v40, %v748_v50  ;;  %vm771_vm4 = vcmp.eq.f32.partialorder %v770_v5, 8.507059e+37  ;;  %vm834_vm5 = vweird.f32 %v828_v47  ;;  %v857_v26 = vadd.s32 (%p2462_p2), 8, %v856_v24 }
 0x150   : > { %v841_v18 = vor.u32 1.1754944e-38, %v840_v9  ;;  %vm839_vm7 = vcmp.eq.f32.partialorder %v838_v12, 8.507059e+37  ;;  %v861_v31 = vadd.s32 (%p2462_p2), 40, %v856_v24  ;;  %vm871_vm8 = vcmp.ge.s32.totalorder (%p2462_p2), %v865_v25, 0 }
 0x151   : > { %v750_v55 = vadd.f32 %v1607_v40, %v749_v52  ;;  %vm877_vm9 = vcmp.lt.s32.totalorder (%p2462_p2), %v865_v25, 40  ;;  %v866_v32 = vadd.s32 (%p2462_p2), %v864_v23, %v857_v26  ;;  %v867_v33 = vadd.s32 (%p2462_p2), %v864_v23, %v858_v27 }
 0x152   : > { %v1611_v56 = vpop.eup %1610  ;;  %vm883_vm10 = vmand (%p2462_p2), %vm871_vm8, %vm877_vm9  ;;  %v868_v35 = vadd.s32 (%p2462_p2), %v864_v23, %v859_v28  ;;  %v869_v36 = vadd.s32 (%p2462_p2), %v864_v23, %v860_v30  ;;  %v870_v37 = vadd.s32 (%p2462_p2), %v864_v23, %v861_v31 }
 0x153   : > { %v754_v58 = vsel %vm753_vm14, %v1607_v40, %v750_v55  ;;  %v762_v59 = vmul.f32 %v1611_v56, %v715_v41  ;;  %vm767_vm0 = vweird.f32 %v1611_v56  ;;  %v907_v38 = vsel (%p2462_p2), %vm883_vm10, %v889_v29, 0.0 }
 0x154   : > { %v1613_v60 = vpop.eup %1612  ;;  %v759_v61 = vsel %vm756_vm15, %v758_v57, %v754_v58  ;;  %vm768_vm3 = vmor %vm766_vm1, %vm767_vm0  ;;  %vm872_vm11 = vcmp.ge.s32.totalorder (%p2462_p2), %v866_v32, 0  ;;  %vm878_vm12 = vcmp.lt.s32.totalorder (%p2462_p2), %v866_v32, 40  ;;  %vm873_vm13 = vcmp.ge.s32.totalorder (%p2462_p2), %v867_v33, 0  ;;  %913 = vst [vmem:[#allocation2] sm:$0xff] (%p2462_p2), %v907_v38 }
 0x155   : > { %v778_v62 = vmul.f32 %v759_v61, %v666_v54  ;;  %v763_v0 = vsub.f32 1.0, %v762_v59  ;;  %v830_v1 = vmul.f32 %v1613_v60, %v828_v47  ;;  %vm835_vm2 = vweird.f32 %v1613_v60  ;;  %vm884_vm14 = vmand (%p2462_p2), %vm872_vm11, %vm878_vm12 }
 0x156   : > { %vm836_vm6 = vmor %vm834_vm5, %vm835_vm2  ;;  %v891_v39 = vld [vmem:[#allocation2 + $0x10] sm:$0xff] (%p2462_p2)  ;;  %vm879_vm15 = vcmp.lt.s32.totalorder (%p2462_p2), %v867_v33, 40  ;;  %vm874_vm0 = vcmp.ge.s32.totalorder (%p2462_p2), %v868_v35, 0  ;;  %vm880_vm1 = vcmp.lt.s32.totalorder (%p2462_p2), %v868_v35, 40  ;;  %vm875_vm2 = vcmp.ge.s32.totalorder (%p2462_p2), %v869_v36, 0 }
 0x157   : > { %782 = vst [vmem:[#allocation2 + $0x18] sm:$0xff] %v778_v62  ;;  %v764_v4 = vmul.f32 %v1611_v56, %v763_v0  ;;  %v831_v7 = vsub.f32 1.0, %v830_v1  ;;  %v908_v41 = vsel (%p2462_p2), %vm884_vm14, %v890_v34, 0.0  ;;  %vm876_vm5 = vcmp.ge.s32.totalorder (%p2462_p2), %v870_v37, 0 }
 0x158   : > { %914 = vst [vmem:[#allocation2 + $0x8] sm:$0xff] (%p2462_p2), %v908_v41 }
 0x159   : > { %v765_v10 = vadd.f32 %v1611_v56, %v764_v4  ;;  %v832_v11 = vmul.f32 %v1613_v60, %v831_v7 }
 0x15b   : > { %v769_v15 = vsel %vm768_vm3, %v1611_v56, %v765_v10  ;;  %v833_v16 = vadd.f32 %v1613_v60, %v832_v11  ;;  %vm885_vm3 = vmand (%p2462_p2), %vm873_vm13, %vm879_vm15 }
 0x15c   : > { %v774_v17 = vsel %vm771_vm4, %v773_v13, %v769_v15  ;;  %vm881_vm4 = vcmp.lt.s32.totalorder (%p2462_p2), %v869_v36, 40  ;;  %v909_v43 = vsel (%p2462_p2), %vm885_vm3, %v891_v39, 0.0 }
 0x15d   : > { %v779_v19 = vmul.f32 %v774_v17, %v669_v8  ;;  %v837_v20 = vsel %vm836_vm6, %v1613_v60, %v833_v16  ;;  %854 = sbr.rel (!%p2462_p2) target bundleno = 363 (0x16b), region = 84  ;;  %vm882_vm6 = vcmp.lt.s32.totalorder (%p2462_p2), %v870_v37, 40  ;;  %915 = vst [vmem:[#allocation2 + $0x10] sm:$0xff] (%p2462_p2), %v909_v43  ;;  %vm887_vm8 = vmand (%p2462_p2), %vm875_vm2, %vm881_vm4 }
 0x15e   : > { %v842_v21 = vsel %vm839_vm7, %v841_v18, %v837_v20  ;;  %v892_v40 = vld [vmem:[#allocation2 + $0x18] sm:$0xff] (%p2462_p2)  ;;  %vm886_vm7 = vmand (%p2462_p2), %vm874_vm0, %vm880_vm1 }
 0x15f   : > { %783 = vst [vmem:[#allocation2 + $0x20] sm:$0xff] %v779_v19  ;;  %v844_v22 = vmul.f32 %v842_v21, %v803_v14  ;;  %v910_v45 = vsel (%p2462_p2), %vm886_vm7, %v892_v40, 0.0  ;;  %vm888_vm9 = vmand (%p2462_p2), %vm876_vm5, %vm882_vm6 }
 0x160   : > { %916 = vst [vmem:[#allocation2 + $0x18] sm:$0xff] (%p2462_p2), %v910_v45 }
 0x161   : > { %845 = vst [vmem:[#allocation2 + $0x28] sm:$0xff] %v844_v22 }
 0x166   : > { %v893_v42 = vld [vmem:[#allocation2 + $0x20] sm:$0xff] }
 0x167   : > { %v911_v46 = vsel %vm887_vm8, %v893_v42, 0.0 }
 0x168   : > { %v894_v44 = vld [vmem:[#allocation2 + $0x28] sm:$0xff]  ;;  %917 = vst [vmem:[#allocation2 + $0x20] sm:$0xff] %v911_v46 }
 0x169   : > { %v912_v47 = vsel %vm888_vm9, %v894_v44, 0.0 }
 0x16a   : > { %918 = vst [vmem:[#allocation2 + $0x28] sm:$0xff] %v912_v47 }
 0x16b PF: > { %v1122_v48 = vld [vmem:[#allocation12 + $0x78] sm:$0xff]  ;;  %v1121_v49 = vld [vmem:[#allocation12 + $0x70] sm:$0xff]  ;;  %v1120_v50 = vld [vmem:[#allocation12 + $0x68] sm:$0xff]  ;;  %s2840_s13 = sld [smem:[#allocation42_spill]]  ;;  %s1175_s25 = sshll.u32 %s2485_s1, 4  ;;  %s1176_s25 = int_to_ptr.vmem [resolvable:$true] %s1175_s25 }
 0x16c   : > { %1127 = vmatpush.msrb.mxu2 %v1122_v48  ;;  %1401 = vmatpush.msrb.mxu3 %v1122_v48  ;;  %v1119_v51 = vld [vmem:[#allocation12 + $0x60] sm:$0xff]  ;;  %v1118_v52 = vld [vmem:[#allocation12 + $0x58] sm:$0xff]  ;;  %v919_v53 = vld [vmem:[#allocation11] sm:$0xff]  ;;  %s2841_s17 = sld [smem:[#allocation25_spill]]  ;;  %s1161_s2 = scalar_lea.sflag [#allocation5], %s2278_s27 }
 0x16d   : > { %v1117_v54 = vld [vmem:[#allocation12 + $0x50] sm:$0xff]  ;;  %v921_v55 = vld [vmem:[#allocation2 + $0x1] sm:$0xff]  ;;  %v2495_v58 = vperm.slane %v919_v53, 0  ;;  %v2497_v59 = vperm.slane %v919_v53, 1  ;;  %v2499_v60 = vperm.slane %v919_v53, 2  ;;  %v2505_v0 = vperm.slane %v919_v53, 3 }
 0x16e   : > { %1128 = vmatpush.msrb.mxu2 %v1121_v49  ;;  %1402 = vmatpush.msrb.mxu3 %v1121_v49  ;;  %v2491_v56 = vld [vmem:[#allocation2 + $0x9] sm:$0xff]  ;;  %v2507_v1 = vperm.slane %v919_v53, 4  ;;  %v2526_v15 = vperm.slane %v919_v53, 5  ;;  %v1115_v27 = vld [vmem:[#allocation12 + $0x40] sm:$0xff]  ;;  %v2542_v31 = vperm.slane %v919_v53, 6  ;;  %v1114_v36 = vld [vmem:[#allocation12 + $0x38] sm:$0xff] }
 0x16f   : > { %v934_v61 = vld [vmem:[#allocation2 + $0x2] sm:$0xff]  ;;  %v2501_v62 = vld [vmem:[#allocation2 + $0xa] sm:$0xff]  ;;  %v926_v3 = vmul.f32 %v2495_v58, %v921_v55  ;;  %v927_v4 = vmul.f32 %v2495_v58, %v2491_v56  ;;  %v2544_v32 = vld [vmem:[#allocation11 + $0x8] sm:$0x7f]  ;;  %v2553_v41 = vperm.slane %v919_v53, 7  ;;  %s2842_s19 = sld [smem:[#allocation26_spill]] }
 0x170   : > { %1129 = vmatpush.msrb.mxu2 %v1120_v50  ;;  %1403 = vmatpush.msrb.mxu3 %v1120_v50  ;;  %v2493_v57 = vld [vmem:[#allocation2 + $0x11] sm:$0xff]  ;;  %v939_v6 = vmul.f32 %v2497_v59, %v934_v61  ;;  %v947_v7 = vld [vmem:[#allocation2 + $0x3] sm:$0xff]  ;;  %v940_v10 = vmul.f32 %v2497_v59, %v2501_v62  ;;  %v2559_v50 = vperm.slane %v2544_v32, 0  ;;  %s2843_s0 = sld [smem:[#allocation44_spill]] }
 0x171   : > { %v2503_v63 = vld [vmem:[#allocation2 + $0x12] sm:$0xff]  ;;  %v928_v5 = vmul.f32 %v2495_v58, %v2493_v57  ;;  %v952_v12 = vmul.f32 %v2499_v60, %v947_v7  ;;  %v960_v13 = vld [vmem:[#allocation2 + $0x4] sm:$0xff]  ;;  %s2844_s29 = sld [smem:[#allocation45_spill]] }
 0x172   : > { %1130 = vmatpush.msrb.mxu2 %v1119_v51  ;;  %1404 = vmatpush.msrb.mxu3 %v1119_v51  ;;  %v2515_v8 = vld [vmem:[#allocation2 + $0xb] sm:$0xff]  ;;  %v2517_v9 = vld [vmem:[#allocation2 + $0x13] sm:$0xff]  ;;  %v941_v11 = vmul.f32 %v2497_v59, %v2503_v63  ;;  %v943_v17 = vadd.f32 %v939_v6, %v926_v3  ;;  %v965_v20 = vmul.f32 %v2505_v0, %v960_v13  ;;  %v2562_v51 = vperm.slane %v2544_v32, 1  ;;  %v1111_v13 = vld [vmem:[#allocation12 + $0x20] sm:$0xff]  ;;  %s1388_s9 = sshll.u32 %s2841_s17, 2 }
 0x173   : > { %v2524_v14 = vld [vmem:[#allocation2 + $0xc] sm:$0xff]  ;;  %v953_v18 = vmul.f32 %v2499_v60, %v2515_v8  ;;  %v954_v19 = vmul.f32 %v2499_v60, %v2517_v9  ;;  %v944_v2 = vadd.f32 %v940_v10, %v927_v4  ;;  %v2535_v24 = vld [vmem:[#allocation2 + $0x14] sm:$0xff]  ;;  %v2573_v10 = vperm.slane %v2544_v32, 2 }
 0x174   : > { %1131 = vmatpush.msrb.mxu2 %v1118_v52  ;;  %1405 = vmatpush.msrb.mxu3 %v1118_v52  ;;  %v1116_v16 = vld [vmem:[#allocation12 + $0x48] sm:$0xff]  ;;  %v945_v23 = vadd.f32 %v941_v11, %v928_v5  ;;  %v966_v25 = vmul.f32 %v2505_v0, %v2524_v14  ;;  %v956_v28 = vadd.f32 %v952_v12, %v943_v17  ;;  %v1113_v46 = vld [vmem:[#allocation12 + $0x30] sm:$0xff]  ;;  %v2567_v3 = vld [vmem:[#allocation2 + $0x19] sm:$0xff] }
 0x175   : > { %v973_v21 = vld [vmem:[#allocation2 + $0x5] sm:$0xff]  ;;  %v2533_v22 = vld [vmem:[#allocation2 + $0xd] sm:$0xff]  ;;  %v957_v33 = vadd.f32 %v953_v18, %v944_v2  ;;  %v967_v37 = vmul.f32 %v2505_v0, %v2535_v24  ;;  %v2569_v4 = vld [vmem:[#allocation2 + $0x1a] sm:$0xff]  ;;  %v1027_v17 = vmul.f32 %v2559_v50, %v2491_v56  ;;  %v1028_v18 = vmul.f32 %v2559_v50, %v2493_v57  ;;  %s1389_s7 = sshll.u32 %s2842_s19, 3 }
 0x176   : > { %1132 = vmatpush.msrb.mxu2 %v1117_v54  ;;  %1406 = vmatpush.msrb.mxu3 %v1117_v54  ;;  %v986_v26 = vld [vmem:[#allocation2 + $0x6] sm:$0xff]  ;;  %v978_v29 = vmul.f32 %v2507_v1, %v973_v21  ;;  %v2540_v30 = vld [vmem:[#allocation2 + $0xe] sm:$0xff]  ;;  %v979_v34 = vmul.f32 %v2507_v1, %v2533_v22  ;;  %v969_v38 = vadd.f32 %v965_v20, %v956_v28  ;;  %v2575_v11 = vld [vmem:[#allocation2 + $0x1b] sm:$0xff]  ;;  %v2588_v2 = vperm.slane %v2544_v32, 3  ;;  %s1172_s23 = sadd.s32 %s1389_s7, %s1388_s9 }
 0x177   : > { %v999_v35 = vld [vmem:[#allocation2 + $0x7] sm:$0xff]  ;;  %v991_v39 = vmul.f32 %v2526_v15, %v986_v26  ;;  %v2551_v40 = vld [vmem:[#allocation2 + $0xf] sm:$0xff]  ;;  %v958_v42 = vadd.f32 %v954_v19, %v945_v23  ;;  %v970_v43 = vadd.f32 %v966_v25, %v957_v33  ;;  %v992_v44 = vmul.f32 %v2526_v15, %v2540_v30  ;;  %v2585_v20 = vld [vmem:[#allocation2 + $0x1c] sm:$0xff]  ;;  %s1390_s5 = sshll.u32 %s1172_s23, 3  ;;  %s1816_s17 = scalar_lea.hbm %s2844_s29, 128 }
 0x178   : > { %1133 = vmatpush.msrb.mxu2 %v1116_v16  ;;  %1407 = vmatpush.msrb.mxu3 %v1116_v16  ;;  %v1012_v45 = vld [vmem:[#allocation2 + $0x8] sm:$0xff]  ;;  %v982_v47 = vadd.f32 %v978_v29, %v969_v38  ;;  %v1004_v48 = vmul.f32 %v2542_v31, %v999_v35  ;;  %v1013_v49 = vld [vmem:[#allocation2 + $0x10] sm:$0xff]  ;;  %v1005_v53 = vmul.f32 %v2542_v31, %v2551_v40  ;;  %v1110_v57 = vld [vmem:[#allocation12 + $0x18] sm:$0xff]  ;;  %s1174_s8 = scalar_lea.hbm %s2844_s29, %s1390_s5 }
 0x179   : > { %v983_v52 = vadd.f32 %v979_v34, %v970_v43  ;;  %v1112_v54 = vld [vmem:[#allocation12 + $0x28] sm:$0xff]  ;;  %v1017_v61 = vmul.f32 %v2553_v41, %v1012_v45  ;;  %v971_v5 = vadd.f32 %v967_v37, %v958_v42  ;;  %v1018_v7 = vmul.f32 %v2553_v41, %v1013_v49  ;;  %v2577_v12 = vld [vmem:[#allocation2 + $0x15] sm:$0xff]  ;;  %v2601_v28 = vld [vmem:[#allocation2 + $0x1d] sm:$0xff]  ;;  %s1177_s26 = sshll.u32 %s1174_s8, 4  ;;  %s1178_s26 = int_to_ptr.hbm [resolvable:$true] %s1177_s26 }
 0x17a   : > { %1134 = vmatpush.msrb.mxu2 %v1115_v27  ;;  %1408 = vmatpush.msrb.mxu3 %v1115_v27  ;;  %v995_v55 = vadd.f32 %v991_v39, %v982_v47  ;;  %v1037_v19 = vmul.f32 %v2562_v51, %v2501_v62  ;;  %v929_v23 = vmul.f32 %v2495_v58, %v2567_v3  ;;  %v2594_v25 = vld [vmem:[#allocation2 + $0x16] sm:$0xff]  ;;  %v2597_v62 = vperm.slane %v2544_v32, 4  ;;  %v2614_v42 = vld [vmem:[#allocation2 + $0x1e] sm:$0xff]  ;;  %s1810_s18 = sshra.s32 %s1178_s26, 4  ;;  %s1811_s18 = int_to_ptr.hbm [resolvable:$true] %s1810_s18 }
 0x17b   : > { %v996_v6 = vadd.f32 %v992_v44, %v983_v52  ;;  %v942_v56 = vmul.f32 %v2497_v59, %v2569_v4  ;;  %v955_v27 = vmul.f32 %v2499_v60, %v2575_v11  ;;  %v980_v29 = vmul.f32 %v2507_v1, %v2577_v12  ;;  %v2605_v33 = vld [vmem:[#allocation2 + $0x17] sm:$0xff]  ;;  %v2627_v52 = vld [vmem:[#allocation2 + $0x1f] sm:$0xff]  ;;  %s1812_s10 = scalar_lea.hbm %s1811_s18, 32  ;;  %p1817_p0 = scmp.lt.s32.totalorder %s1811_s18, %s2844_s29 }
 0x17c   : > { %1135 = vmatpush.msrb.mxu2 %v1114_v36  ;;  %1409 = vmatpush.msrb.mxu3 %v1114_v36  ;;  %v1008_v16 = vadd.f32 %v1004_v48, %v995_v55  ;;  %v1047_v58 = vmul.f32 %v2573_v10, %v2515_v8  ;;  %v2610_v59 = vperm.slane %v2544_v32, 5  ;;  %v968_v35 = vmul.f32 %v2505_v0, %v2585_v20  ;;  %v1014_v60 = vld [vmem:[#allocation2 + $0x18] sm:$0xff]  ;;  %v1109_v36 = vld [vmem:[#allocation12 + $0x10] sm:$0xff]  ;;  %v1107_v55 = vld [vmem:[#allocation12] sm:$0xff]  ;;  %p1813_p8 = scmp.ne.s32.totalorder %s1811_s18, %s1812_s10  ;;  %p1818_p4 = scmp.lt.s32.totalorder %s1816_s17, %s1812_s10 }
 0x17d   : > { %v1009_v21 = vadd.f32 %v1005_v53, %v996_v6  ;;  %v946_v34 = vadd.f32 %v942_v56, %v929_v23  ;;  %v984_v39 = vadd.f32 %v980_v29, %v971_v5  ;;  %v993_v43 = vmul.f32 %v2526_v15, %v2594_v25  ;;  %v1015_v6 = vld [vmem:[#allocation2 + $0x20] sm:$0xff] }
 0x17e   : > { %1136 = vmatpush.msrb.mxu2 %v1113_v46  ;;  %1410 = vmatpush.msrb.mxu3 %v1113_v46  ;;  %v1021_v26 = vadd.f32 %v1017_v61, %v1008_v16  ;;  %v2619_v8 = vperm.slane %v2544_v32, 6  ;;  %v981_v45 = vmul.f32 %v2507_v1, %v2601_v28  ;;  %v1006_v0 = vmul.f32 %v2542_v31, %v2605_v33  ;;  %v1108_v46 = vld [vmem:[#allocation12 + $0x8] sm:$0xff]  ;;  %p1814_p9 = pnand %p1813_p8, %p2219_p5  ;;  %p1819_p12 = por %p1818_p4, %p1817_p0 }
 0x17f   : > { %v1022_v37 = vadd.f32 %v1018_v7, %v1009_v21  ;;  %v959_v44 = vadd.f32 %v955_v27, %v946_v34  ;;  %v1057_v48 = vmul.f32 %v2588_v2, %v2524_v14  ;;  %v997_v49 = vadd.f32 %v993_v43, %v984_v39  ;;  %v1025_v21 = vld [vmem:[#allocation2 + $0x21] sm:$0xff] }
 0x180   : > { %1137 = vmatpush.msrb.mxu2 %v1112_v54  ;;  %1411 = vmatpush.msrb.mxu3 %v1112_v54  ;;  %v1031_v38 = vadd.f32 %v1027_v17, %v1021_v26  ;;  %v1019_v53 = vmul.f32 %v2553_v41, %v1014_v60  ;;  %v1067_v32 = vmul.f32 %v2597_v62, %v2533_v22  ;;  %v1035_v26 = vld [vmem:[#allocation2 + $0x22] sm:$0xff]  ;;  %p1815_p13 = pneg %p1814_p9 }
 0x181   : > { %v972_v54 = vadd.f32 %v968_v35, %v959_v44  ;;  %v994_v1 = vmul.f32 %v2526_v15, %v2614_v42  ;;  %v1077_v5 = vmul.f32 %v2610_v59, %v2540_v30  ;;  %v1010_v14 = vadd.f32 %v1006_v0, %v997_v49  ;;  %v1045_v35 = vld [vmem:[#allocation2 + $0x23] sm:$0xff] }
 0x182   : > { %1138 = vmatpush.msrb.mxu2 %v1111_v13  ;;  %1412 = vmatpush.msrb.mxu3 %v1111_v13  ;;  %v1041_v47 = vadd.f32 %v1037_v19, %v1031_v38  ;;  %v1029_v7 = vmul.f32 %v2559_v50, %v2567_v3  ;;  %v1032_v13 = vadd.f32 %v1028_v18, %v1022_v37  ;;  %v1055_v39 = vld [vmem:[#allocation2 + $0x24] sm:$0xff]  ;;  %p1820_p10 = pnand %p1819_p12, %p1815_p13 }
 0x183   : > { %v985_v16 = vadd.f32 %v981_v45, %v972_v54  ;;  %v1007_v22 = vmul.f32 %v2542_v31, %v2627_v52  ;;  %v1087_v15 = vmul.f32 %v2619_v8, %v2551_v40  ;;  %v1023_v19 = vadd.f32 %v1019_v53, %v1010_v14  ;;  %v1075_v54 = vld [vmem:[#allocation2 + $0x26] sm:$0xff] }
 0x184   : > { %1139 = vmatpush.msrb.mxu2 %v1110_v57  ;;  %1413 = vmatpush.msrb.mxu3 %v1110_v57  ;;  %v1051_v61 = vadd.f32 %v1047_v58, %v1041_v47  ;;  %v1039_v30 = vmul.f32 %v2562_v51, %v2569_v4  ;;  %v1020_v3 = vmul.f32 %v2553_v41, %v1015_v6  ;;  %v1065_v47 = vld [vmem:[#allocation2 + $0x25] sm:$0xff] }
 0x185   : > { %v998_v23 = vadd.f32 %v994_v1, %v985_v16  ;;  %v1038_v18 = vmul.f32 %v2562_v51, %v2503_v63  ;;  %v1033_v57 = vadd.f32 %v1029_v7, %v1023_v19  ;;  %v1049_v31 = vmul.f32 %v2573_v10, %v2575_v11  ;;  %v1614_v63 = vld [vmem:[%s2840_s13] ss:$0 sm:$0xff] }
 0x186   : > { %1140 = vmatpush.msrb.mxu2 %v1109_v36  ;;  %1414 = vmatpush.msrb.mxu3 %v1109_v36  ;;  %v1061_v17 = vadd.f32 %v1057_v48, %v1051_v61  ;;  %v1048_v40 = vmul.f32 %v2573_v10, %v2517_v9  ;;  %v1030_v4 = vmul.f32 %v2559_v50, %v1025_v21  ;;  %v1085_v61 = vld [vmem:[#allocation2 + $0x27] sm:$0xff] }
 0x187   : > { %v1011_v27 = vadd.f32 %v1007_v22, %v998_v23  ;;  %v1042_v29 = vadd.f32 %v1038_v18, %v1032_v13  ;;  %v1058_v58 = vmul.f32 %v2588_v2, %v2535_v24  ;;  %v1043_v34 = vadd.f32 %v1039_v30, %v1033_v57 }
 0x188   : > { %1141 = vmatpush.msrb.mxu2 %v1108_v46  ;;  %1415 = vmatpush.msrb.mxu3 %v1108_v46  ;;  %v1071_v56 = vadd.f32 %v1067_v32, %v1061_v17  ;;  %v1059_v11 = vmul.f32 %v2588_v2, %v2585_v20  ;;  %v1068_v36 = vmul.f32 %v2597_v62, %v2577_v12 }
 0x189   : > { %v1024_v60 = vadd.f32 %v1020_v3, %v1011_v27  ;;  %v1052_v9 = vadd.f32 %v1048_v40, %v1042_v29  ;;  %v1040_v50 = vmul.f32 %v2562_v51, %v1035_v26  ;;  %v1053_v38 = vadd.f32 %v1049_v31, %v1043_v34 }
 0x18a   : > { %1142 = vmatpush.msrb.mxu2 %v1107_v55  ;;  %1416 = vmatpush.msrb.mxu3 %v1107_v55  ;;  %v1081_v41 = vadd.f32 %v1077_v5, %v1071_v56  ;;  %v1069_v24 = vmul.f32 %v2597_v62, %v2601_v28  ;;  %v1078_v45 = vmul.f32 %v2610_v59, %v2594_v25 }
 0x18b   : > { %v1034_v43 = vadd.f32 %v1030_v4, %v1024_v60  ;;  %v1062_v44 = vadd.f32 %v1058_v58, %v1052_v9  ;;  %v1050_v20 = vmul.f32 %v2573_v10, %v1045_v35  ;;  %v1063_v46 = vadd.f32 %v1059_v11, %v1053_v38 }
 0x18c   : > { %v1091_v37 = vadd.f32 %v1087_v15, %v1081_v41  ;;  %v1079_v12 = vmul.f32 %v2610_v59, %v2614_v42  ;;  %v1088_v48 = vmul.f32 %v2619_v8, %v2605_v33  ;;  %v1060_v28 = vmul.f32 %v2588_v2, %v1055_v39 }
 0x18d   : > { %v1072_v51 = vadd.f32 %v1068_v36, %v1062_v44  ;;  %v1044_v49 = vadd.f32 %v1040_v50, %v1034_v43  ;;  %v1073_v32 = vadd.f32 %v1069_v24, %v1063_v46  ;;  %v1089_v25 = vmul.f32 %v2619_v8, %v2627_v52 }
 0x18e   : > { %v1099_v0 = vadd.f32 %v1614_v63, %v1091_v37  ;;  %v1070_v55 = vmul.f32 %v2597_v62, %v1065_v47  ;;  %v1080_v33 = vmul.f32 %v2610_v59, %v1075_v54  ;;  %v1090_v13 = vmul.f32 %v2619_v8, %v1085_v61  ;;  %v1615_v59 = vld [vmem:[%s2843_s0] ss:$0 sm:$0xff] }
 0x18f   : > { %v1082_v10 = vadd.f32 %v1078_v45, %v1072_v51  ;;  %v1054_v1 = vadd.f32 %v1050_v20, %v1044_v49  ;;  %v1083_v42 = vadd.f32 %v1079_v12, %v1073_v32 }
 0x190   : > { %v1103_v53 = vmax.f32 %v1099_v0, 0.0 }
 0x191   : > { %v1092_v5 = vadd.f32 %v1088_v48, %v1082_v10  ;;  %v1064_v14 = vadd.f32 %v1060_v28, %v1054_v1  ;;  %v1093_v6 = vadd.f32 %v1089_v25, %v1083_v42 }
 0x192   : > { %1143 = vmatmul.f32.vlgmr.msrb.gmra.mxu2 %v1103_v53 }
 0x193   : > { %v1100_v7 = vadd.f32 %v1614_v63, %v1092_v5  ;;  %v1074_v2 = vadd.f32 %v1070_v55, %v1064_v14  ;;  %v1101_v52 = vadd.f32 %v1614_v63, %v1093_v6 }
 0x195   : > { %v1104_v16 = vmax.f32 %v1100_v7, 0.0  ;;  %v1084_v22 = vadd.f32 %v1080_v33, %v1074_v2  ;;  %v1105_v17 = vmax.f32 %v1101_v52, 0.0 }
 0x197   : > { %v1094_v62 = vadd.f32 %v1090_v13, %v1084_v22  ;;  %1149 = vmatmul.f32.vlgmr.msrb.gmra.mxu3 %v1105_v17 }
 0x199   : > { %v1102_v15 = vadd.f32 %v1614_v63, %v1094_v62 }
 0x19a   : > { %1146 = vmatmul.f32.gmra.mxu2 %v1104_v16 }
 0x19b   : > { %v1106_v19 = vmax.f32 %v1102_v15, 0.0 }
 0x19f   : > { %1152 = vmatmul.f32.gmra.mxu3 %v1106_v19 }
 0x215   : > { %v1144_v21 = vpop.f32.mrf.mxu2 }
 0x216   : > { %v1145_v8 = vadd.f32 %v1615_v59, %v1144_v21 }
 0x218   : > { %1156 = vst [vmem:[%s2485_s1] sm:$0xff] %v1145_v8 }
 0x21a   : > { %v1150_v30 = vpop.f32.mrf.mxu3 }
 0x21b   : > { %v1151_v3 = vadd.f32 %v1615_v59, %v1150_v30 }
 0x21d   : > { %v1147_v23 = vpop.f32.mrf.mxu2  ;;  %1158 = vst [vmem:[%s2485_s1 + $0x10] sm:$0xff] %v1151_v3 }
 0x21e   : > { %v1148_v18 = vadd.f32 %v1615_v59, %v1147_v23 }
 0x220   : > { %1157 = vst [vmem:[%s2485_s1 + $0x8] sm:$0xff] %v1148_v18 }
 0x222   : > { %v1153_v56 = vpop.f32.mrf.mxu3 }
 0x223   : > { %v1154_v57 = vadd.f32 %v1615_v59, %v1153_v56 }
 0x225   : > { %1159 = vst [vmem:[%s2485_s1 + $0x18] sm:$0xff] %v1154_v57 }
 0x226   : > { %1823 = shalt.err (!%p1820_p10)
}
 0x227   : > { %s1967_s27 = smov 128   ;;  %s1968_s1 = smov 8  }
 0x228   : > { %1435 = dma.vmem_to_hbm [thread:$0]  (%p2219_p5), %s1176_s25, 512, %s1178_s26, %s1161_s2, %s1967_s27, %s1967_s27, %s1968_s1  }
 0x229 PF: > { %p1468_p7 = scmp.ge.s32.totalorder %s1958_s22, 2  ;;  %s1192_s28 = sand.u32 1, %s1930_s15  }
 0x22a   : > { %s1193_s0 = scalar_lea.sflag [#allocation5], %s1192_s28 }
 0x22b   : > { %p1458_p6 = pnand %p1468_p7, %p2223_p11 }
 0x22d   : > { %p1459_p1 = pneg %p1458_p6 }
 0x22f   : > { %1901 = dma.done.wait (%p1459_p1), %s1193_s0, 512  }
 0x230   : > { %1903 = vsyncadd (%p1459_p1), %s1193_s0, 4294966784  ;;  %s30_s22 = sadd.s32 1, %s1958_s22   ;;  %s2846_s30 = sld [smem:[#allocation22_spill]] }
 0x231   : > { %p2706_p3 = scmp.ge.s32.totalorder %s30_s22, 6   ;;  %s2847_s20 = sld [smem:[#allocation23_spill]] }
 0x232   : > { %s2848_s7 = smov %s2161_s12  ;;  %s2849_s23 = sld [smem:[#allocation24_spill]] }
 0x233   : > { %s2850_s17 = sld [smem:[#allocation35_spill]]  ;;  %s2855_s10 = smov %s1914_s11 }
 0x234   : > { %s2851_s18 = sld [smem:[#allocation27_spill]]  ;;  %s2856_s11 = smov %s2265_s21 }
 0x235   : > { %s2852_s19 = sld [smem:[#allocation28_spill]]  ;;  %s2858_s13 = smov %s1926_s14 }
 0x236   : > { %s2853_s3 = sld [smem:[#allocation30_spill]]  ;;  %s2859_s14 = smov %s2848_s7 }
 0x237   : > { %s2854_s5 = sld [smem:[#allocation31_spill]]  ;;  %s2857_s12 = smov %s2847_s20 }
 0x238   : > { %s2860_s15 = smov %s1934_s16  ;;  %s2861_s16 = smov %s2849_s23 }
 0x239   :  { %29 = sbr.rel (!%p2706_p3) target bundleno = 25 (0x19), region = 141 }
 0x23c   : > { %s2862_s20 = smov %s2853_s3 }
 0x23d   : > { %s2863_s21 = smov %s2854_s5 }
 0x23e   :  { %1199 = vsyncpa [#allocation4], 1 }
 0x23f   :  { %1201 = vsyncpa [#allocation4 + $0x1], 1 }
 0x240   :  { %1202 = vsyncpa [#allocation7], 1 }
 0x241   :  { %1204 = vsyncpa [#allocation7 + $0x1], 1 }
 0x242   :  { %1205 = vsyncpa [#allocation10], 1 }
 0x243   :  { %1206 = vsyncpa [#allocation13], 1 }
 0x244   :  { %1207 = vsyncpa [#allocation5], 1 }
 0x245   :  { %1209 = vsyncpa [#allocation5 + $0x1], 1 }

</bundles_post_ra>
